<compile_context>
chip_gen: v7x
topology: tpu7x:2x2x1
jax: 0.10.0
libtpu: 0.0.40
codegen_flags: <defaults>
</compile_context>

<pallas_src>
import math

import jax
import jax.numpy as jnp
from jax.experimental import pallas as pl
from jax.experimental.pallas import tpu as pltpu

# ---------------- model config ----------------
VOCAB = 128
BLOCK_SIZE = 8
N_LAYER = 2
N_HEAD = 4
N_EMBD = 32
HEAD_DIM = N_EMBD // N_HEAD          # 4
BATCH = 2
SEQ = 8                              # T <= BLOCK_SIZE
BT = BATCH * SEQ                     # 16 flattened (batch, time) rows
HBT = N_HEAD * BT                    # 64 widened key axis (head-blocked)
LN_EPS = 1e-5
GELU_K = math.sqrt(2.0 / math.pi)
NEG_BIG = -1e30                      # finite additive mask (no inf - inf NaN)

# ---------------- slab32 layout (width = N_EMBD = 32 lanes) ----------------
R_WTE = 0                            # (VOCAB, C) token embedding
R_POS = R_WTE + VOCAB                # (BT, C)  fused pos emb, pre-tiled over B
R_LNF_W = R_POS + BT
R_LNF_B = R_LNF_W + 1
GLOB32_ROWS = 152                    # padded to a multiple of 8

# per-layer block offsets inside slab32 (all weight blocks start on 8-multiples)
O_WQ = 0                             # (C, C)  pre-scaled by 1/sqrt(HEAD_DIM)
O_WK = O_WQ + N_EMBD
O_WV = O_WK + N_EMBD
O_WAPROJ = O_WV + N_EMBD
O_WMPROJ = O_WAPROJ + N_EMBD         # (4C, C)
O_LN1W = O_WMPROJ + 4 * N_EMBD
O_LN1B = O_LN1W + 1
O_LN2W = O_LN1B + 1
O_LN2B = O_LN2W + 1
O_BQ = O_LN2B + 1                    # pre-scaled
O_BK = O_BQ + 1
O_BV = O_BK + 1
O_BAPROJ = O_BV + 1
O_BMPROJ = O_BAPROJ + 1
L32_ROWS = 272                       # padded to a multiple of 8
S32_ROWS = GLOB32_ROWS + N_LAYER * L32_ROWS

# ---------------- slab128 layout (width = 128 lanes) ----------------
O_WFC = 0                            # (C, 4C)
O_BFC = N_EMBD                       # single row
L128_ROWS = 40
R_WHEAD = N_LAYER * L128_ROWS        # (C, VOCAB)
R_BIAS = R_WHEAD + N_EMBD            # (BT, HBT)   causal+batch additive bias
R_KMASK = R_BIAS + BT                # (C, HBT)    head selector for K
R_VMASK = R_KMASK + N_EMBD           # (HBT, C)    head selector for V / denom
S128_ROWS = R_VMASK + HBT


# ---------------- fused forward kernel ----------------
def _gpt_forward_kernel(idx_ref, s32_ref, s128_ref, logits_ref):
    f32 = jnp.float32
    C, V, H = N_EMBD, VOCAB, N_HEAD

    def layer_norm(h, w, b):
        mu = jnp.mean(h, axis=-1, keepdims=True)
        var = jnp.mean(jnp.square(h - mu), axis=-1, keepdims=True)
        return (h - mu) * jax.lax.rsqrt(var + LN_EPS) * w + b

    # ---- token embedding: one-hot gather on the MXU + fused positional emb ----
    ids = idx_ref[...]                                                  # (BT, 1)
    one_hot = (jax.lax.broadcasted_iota(jnp.int32, (BT, V), 1) == ids).astype(f32)
    x = jnp.dot(one_hot, s32_ref[R_WTE:R_WTE + V, :],
                preferred_element_type=f32)                             # (BT, C)
    x = x + s32_ref[R_POS:R_POS + BT, :]      # sin + learned + wpe, pre-tiled

    # ---- loop-invariant attention constants (precomputed host-side) ----
    bias = s128_ref[R_BIAS:R_BIAS + BT, 0:HBT]       # (BT, HBT)
    kmask = s128_ref[R_KMASK:R_KMASK + C, 0:HBT]     # (C, HBT)
    vmask = s128_ref[R_VMASK:R_VMASK + HBT, 0:C]     # (HBT, C)

    for l in range(N_LAYER):                          # L=2, fully unrolled
        b32 = GLOB32_ROWS + l * L32_ROWS
        b128 = l * L128_ROWS

        # ---------- causal self-attention (block-diagonal head packing) ----------
        h = layer_norm(x,
                       s32_ref[b32 + O_LN1W:b32 + O_LN1W + 1, :],
                       s32_ref[b32 + O_LN1B:b32 + O_LN1B + 1, :])
        q = (jnp.dot(h, s32_ref[b32 + O_WQ:b32 + O_WQ + C, :],
                     preferred_element_type=f32)
             + s32_ref[b32 + O_BQ:b32 + O_BQ + 1, :])                   # pre-scaled
        k = (jnp.dot(h, s32_ref[b32 + O_WK:b32 + O_WK + C, :],
                     preferred_element_type=f32)
             + s32_ref[b32 + O_BK:b32 + O_BK + 1, :])
        v = (jnp.dot(h, s32_ref[b32 + O_WV:b32 + O_WV + C, :],
                     preferred_element_type=f32)
             + s32_ref[b32 + O_BV:b32 + O_BV + 1, :])

        # block-diagonal K: column h*BT+m holds key m restricted to head h's dims
        kbd = jnp.concatenate([k.T] * H, axis=1) * kmask                # (C, HBT)
        s = jnp.dot(q, kbd, preferred_element_type=f32) + bias          # (BT, HBT)
        # per-row max is a valid (exact) shift for every per-head softmax group;
        # masked entries (-1e30) underflow cleanly to 0 in exp.
        p = jnp.exp(s - jnp.max(s, axis=-1, keepdims=True))

        # block-diagonal V: row h*BT+m holds value m restricted to head h's dims,
        # so p @ vbd lands directly in the merged (BT, C) head layout.
        vbd = jnp.concatenate([v] * H, axis=0) * vmask                  # (HBT, C)
        y_num = jnp.dot(p, vbd, preferred_element_type=f32)             # (BT, C)
        y_den = jnp.dot(p, vmask, preferred_element_type=f32)           # per-head sums
        y = y_num * pl.reciprocal(y_den, approx=True)                   # EUP slot

        x = x + (jnp.dot(y, s32_ref[b32 + O_WAPROJ:b32 + O_WAPROJ + C, :],
                         preferred_element_type=f32)
                 + s32_ref[b32 + O_BAPROJ:b32 + O_BAPROJ + 1, :])

        # ---------- MLP ----------
        h2 = layer_norm(x,
                        s32_ref[b32 + O_LN2W:b32 + O_LN2W + 1, :],
                        s32_ref[b32 + O_LN2B:b32 + O_LN2B + 1, :])
        a = (jnp.dot(h2, s128_ref[b128 + O_WFC:b128 + O_WFC + C, :],
                     preferred_element_type=f32)
             + s128_ref[b128 + O_BFC:b128 + O_BFC + 1, :])              # (BT, 4C)
        g = 0.5 * a * (1.0 + jnp.tanh(GELU_K * (a + 0.044715 * a * a * a)))
        x = x + (jnp.dot(g, s32_ref[b32 + O_WMPROJ:b32 + O_WMPROJ + 4 * C, :],
                         preferred_element_type=f32)
                 + s32_ref[b32 + O_BMPROJ:b32 + O_BMPROJ + 1, :])

    # ---------- final LN + LM head, lane-dense (BT, 128) store ----------
    # (computing all BT rows; restricting to the B last-position rows would save
    #  ~nothing at this size -- the row gather cancels the matmul/DMA shrink)
    xf = layer_norm(x,
                    s32_ref[R_LNF_W:R_LNF_W + 1, :],
                    s32_ref[R_LNF_B:R_LNF_B + 1, :])
    logits_ref[...] = jnp.dot(xf, s128_ref[R_WHEAD:R_WHEAD + C, :],
                              preferred_element_type=f32).astype(logits_ref.dtype)


# ---------------- host-side packing of the 20 natural params into 2 slabs ----
def pack_params(p):
    f32 = jnp.float32
    C, V, T, B, H, HD = N_EMBD, VOCAB, SEQ, BATCH, N_HEAD, HEAD_DIM
    scale = 1.0 / math.sqrt(HD)

    s32 = jnp.zeros((S32_ROWS, C), f32)
    s32 = s32.at[R_WTE:R_WTE + V].set(p['wte'])
    pos = p['pe_sin'][:T] + p['pe_learned'][:T] + p['wpe'][:T]          # (T, C)
    s32 = s32.at[R_POS:R_POS + BT].set(jnp.tile(pos, (B, 1)))
    s32 = s32.at[R_LNF_W].set(p['lnf_w'][0])
    s32 = s32.at[R_LNF_B].set(p['lnf_b'][0])
    for l in range(N_LAYER):
        base = GLOB32_ROWS + l * L32_ROWS
        wqkv = p['w_qkv'][l]                                            # (C, 3C)
        bqkv = p['b_qkv'][l, 0]                                         # (3C,)
        s32 = s32.at[base + O_WQ:base + O_WQ + C].set(wqkv[:, 0:C] * scale)
        s32 = s32.at[base + O_WK:base + O_WK + C].set(wqkv[:, C:2 * C])
        s32 = s32.at[base + O_WV:base + O_WV + C].set(wqkv[:, 2 * C:3 * C])
        s32 = s32.at[base + O_WAPROJ:base + O_WAPROJ + C].set(p['w_aproj'][l])
        s32 = s32.at[base + O_WMPROJ:base + O_WMPROJ + 4 * C].set(p['w_mproj'][l])
        s32 = s32.at[base + O_LN1W].set(p['ln1_w'][l, 0])
        s32 = s32.at[base + O_LN1B].set(p['ln1_b'][l, 0])
        s32 = s32.at[base + O_LN2W].set(p['ln2_w'][l, 0])
        s32 = s32.at[base + O_LN2B].set(p['ln2_b'][l, 0])
        s32 = s32.at[base + O_BQ].set(bqkv[0:C] * scale)
        s32 = s32.at[base + O_BK].set(bqkv[C:2 * C])
        s32 = s32.at[base + O_BV].set(bqkv[2 * C:3 * C])
        s32 = s32.at[base + O_BAPROJ].set(p['b_aproj'][l, 0])
        s32 = s32.at[base + O_BMPROJ].set(p['b_mproj'][l, 0])

    s128 = jnp.zeros((S128_ROWS, 128), f32)
    for l in range(N_LAYER):
        base = l * L128_ROWS
        s128 = s128.at[base + O_WFC:base + O_WFC + C].set(p['w_fc'][l])
        s128 = s128.at[base + O_BFC].set(p['b_fc'][l, 0])
    s128 = s128.at[R_WHEAD:R_WHEAD + C].set(p['w_head'])

    # combined causal + same-batch additive bias, tiled per head along lanes
    n = jnp.arange(BT)
    same_b = (n[:, None] // T) == (n[None, :] // T)
    causal = (n[None, :] % T) <= (n[:, None] % T)
    bias_bt = jnp.where(same_b & causal, 0.0, NEG_BIG).astype(f32)      # (BT, BT)
    s128 = s128.at[R_BIAS:R_BIAS + BT, 0:HBT].set(jnp.tile(bias_bt, (1, H)))

    # head-selector masks for the block-diagonal K / V packing
    c = jnp.arange(C)
    j = jnp.arange(HBT)
    kmask = (c[:, None] // HD == j[None, :] // BT).astype(f32)          # (C, HBT)
    s128 = s128.at[R_KMASK:R_KMASK + C, 0:HBT].set(kmask)
    s128 = s128.at[R_VMASK:R_VMASK + HBT, 0:C].set(kmask.T)             # (HBT, C)
    return s32, s128


# ---------------- wrapper ----------------
def gpt_forward(idx, packed):
    """idx: (B, T) int32 tokens; packed = pack_params(params).
    Returns logits (B, 1, VOCAB) for the last position (inference path)."""
    s32, s128 = packed
    B, T = idx.shape
    idx_flat = idx.reshape(B * T, 1).astype(jnp.int32)
    vmem = pl.BlockSpec(memory_space=pltpu.MemorySpace.VMEM)

    # Single invocation, no grid: ~250 KB resident, every byte DMA'd once.
    # Keep single-TensorCore even on v7x -- at B=2/T=8 a grid=(B,) "parallel"
    # split would cost more in per-core launch/sync than the total work.
    logits_all = pl.pallas_call(
        _gpt_forward_kernel,
        out_shape=jax.ShapeDtypeStruct((B * T, VOCAB), jnp.float32),
        in_specs=[vmem, vmem, vmem],
        out_specs=vmem,
    )(idx_flat, s32, s128)

    # last-position selection is free layout plumbing outside the kernel
    return logits_all.reshape(B, T, VOCAB)[:, -1:, :]


# ---------------- parameters (deterministic, shapes mirror the nn.Module) ----
def init_params(key):
    C, V, L, BS = N_EMBD, VOCAB, N_LAYER, BLOCK_SIZE
    keys = jax.random.split(key, 20)

    def nrm(k, shape, s=0.15):
        return jax.random.normal(k, shape, jnp.float32) * s

    # sinusoidal positional embedding (matches _init_sin_pos_emb)
    position = jnp.arange(BS, dtype=jnp.float32)[:, None]
    div_term = jnp.exp(jnp.arange(0, C, 2, dtype=jnp.float32)
                       * (-math.log(10000.0) / C))
    pe = jnp.zeros((BS, C), jnp.float32)
    pe = pe.at[:, 0::2].set(jnp.sin(position * div_term))
    pe = pe.at[:, 1::2].set(jnp.cos(position * div_term))

    return dict(
        wte=nrm(keys[0], (V, C)),
        wpe=nrm(keys[1], (BS, C)),
        pe_sin=pe,
        pe_learned=nrm(keys[2], (BS, C), 0.05),
        ln1_w=1.0 + nrm(keys[3], (L, 1, C), 0.05),
        ln1_b=nrm(keys[4], (L, 1, C), 0.05),
        w_qkv=nrm(keys[5], (L, C, 3 * C)),
        b_qkv=nrm(keys[6], (L, 1, 3 * C), 0.05),
        w_aproj=nrm(keys[7], (L, C, C)),
        b_aproj=nrm(keys[8], (L, 1, C), 0.05),
        ln2_w=1.0 + nrm(keys[9], (L, 1, C), 0.05),
        ln2_b=nrm(keys[10], (L, 1, C), 0.05),
        w_fc=nrm(keys[11], (L, C, 4 * C)),
        b_fc=nrm(keys[12], (L, 1, 4 * C), 0.05),
        w_mproj=nrm(keys[13], (L, 4 * C, C)),
        b_mproj=nrm(keys[14], (L, 1, C), 0.05),
        lnf_w=1.0 + nrm(keys[15], (1, C), 0.05),
        lnf_b=nrm(keys[16], (1, C), 0.05),
        w_head=nrm(keys[17], (C, V)),
    )


# ---------------- pure-JAX reference (mirrors the PyTorch forward) ----------
def reference_forward(idx, p):
    B, T = idx.shape
    C, H, HD, L = N_EMBD, N_HEAD, HEAD_DIM, N_LAYER

    def ln(h, w, b):
        mu = h.mean(-1, keepdims=True)
        var = ((h - mu) ** 2).mean(-1, keepdims=True)
        return (h - mu) / jnp.sqrt(var + LN_EPS) * w + b

    tok_emb = p['wte'][idx]                                             # (B,T,C)
    pos_emb = p['pe_sin'][:T] + p['pe_learned'][:T] + p['wpe'][:T]
    x = tok_emb + pos_emb[None]
    mask = jnp.tril(jnp.ones((T, T), dtype=bool))

    for l in range(L):
        h = ln(x, p['ln1_w'][l, 0], p['ln1_b'][l, 0])
        qkv = h @ p['w_qkv'][l] + p['b_qkv'][l, 0]
        q, k, v = jnp.split(qkv, 3, axis=-1)

        def heads(t):
            return t.reshape(B, T, H, HD).transpose(0, 2, 1, 3)

        q, k, v = heads(q), heads(k), heads(v)
        att = (q @ jnp.swapaxes(k, -1, -2)) * (1.0 / math.sqrt(HD))
        att = jnp.where(mask[None, None], att, -jnp.inf)
        att = jax.nn.softmax(att, axis=-1)
        y = (att @ v).transpose(0, 2, 1, 3).reshape(B, T, C)
        x = x + y @ p['w_aproj'][l] + p['b_aproj'][l, 0]

        h2 = ln(x, p['ln2_w'][l, 0], p['ln2_b'][l, 0])
        a = h2 @ p['w_fc'][l] + p['b_fc'][l, 0]
        g = 0.5 * a * (1.0 + jnp.tanh(math.sqrt(2.0 / math.pi)
                                      * (a + 0.044715 * a ** 3)))
        x = x + g @ p['w_mproj'][l] + p['b_mproj'][l, 0]

    x = ln(x, p['lnf_w'][0], p['lnf_b'][0])
    return x[:, -1:, :] @ p['w_head']                                   # (B,1,V)


if __name__ == "__main__":
    key = jax.random.PRNGKey(0)
    k_idx, k_params = jax.random.split(key)
    params = init_params(k_params)
    idx = jax.random.randint(k_idx, (BATCH, SEQ), 0, VOCAB, dtype=jnp.int32)

    packed = pack_params(params)          # host-side, once per weight set
    logits = gpt_forward(idx, packed)
    logits = jax.block_until_ready(logits)

    ref = reference_forward(idx, params)
    assert logits.shape == (BATCH, 1, VOCAB)
    err = jnp.max(jnp.abs(logits - ref))
    assert jnp.allclose(logits, ref, atol=2e-2, rtol=2e-2), f"max abs err {err}"

    print("KERNEL_OK")
</pallas_src>

<mosaic_0001>
module attributes {stable_mosaic.version = 11 : i64} {
  func.func @_gpt_forward_kernel(%arg0: memref<16x1xi32, #tpu.memory_space<vmem>>, %arg1: memref<696x32xf32, #tpu.memory_space<vmem>>, %arg2: memref<224x128xf32, #tpu.memory_space<vmem>>, %arg3: memref<16x128xf32, #tpu.memory_space<vmem>>) attributes {dimension_semantics = [], scalar_prefetch = 0 : i64, scratch_operands = 0 : i64, tpu.core_type = #tpu.core_type<tc>} {
    %c0 = arith.constant 0 : index
    %c0_0 = arith.constant 0 : index
    %0 = vector.load %arg0[%c0, %c0_0] : memref<16x1xi32, #tpu.memory_space<vmem>>, vector<16x1xi32>
    %1 = tpu.iota {dimensions = array<i32: 1>} : vector<16x128xi32>
    %2 = vector.broadcast %0 : vector<16x1xi32> to vector<16x128xi32>
    %3 = arith.cmpi eq, %1, %2 : vector<16x128xi32>
    %4 = arith.extui %3 : vector<16x128xi1> to vector<16x128xi32>
    %5 = arith.sitofp %4 : vector<16x128xi32> to vector<16x128xf32>
    %c0_1 = arith.constant 0 : index
    %c0_2 = arith.constant 0 : index
    %6 = vector.load %arg1[%c0_1, %c0_2] : memref<696x32xf32, #tpu.memory_space<vmem>>, vector<128x32xf32>
    %cst = arith.constant dense<0.000000e+00> : vector<16x32xf32>
    %7 = tpu.matmul %5, %6, %cst {dimension_numbers = #tpu.dot_dimension_numbers<[1], [0], [0], [1], [0, 0, 1, 1], [], []>} : vector<16x128xf32>, vector<128x32xf32>, vector<16x32xf32> -> vector<16x32xf32>
    %c128 = arith.constant 128 : index
    %c0_3 = arith.constant 0 : index
    %8 = vector.load %arg1[%c128, %c0_3] : memref<696x32xf32, #tpu.memory_space<vmem>>, vector<16x32xf32>
    %9 = arith.addf %7, %8 : vector<16x32xf32>
    %c112 = arith.constant 112 : index
    %c0_4 = arith.constant 0 : index
    %10 = vector.load %arg2[%c112, %c0_4] : memref<224x128xf32, #tpu.memory_space<vmem>>, vector<16x64xf32>
    %c128_5 = arith.constant 128 : index
    %c0_6 = arith.constant 0 : index
    %11 = vector.load %arg2[%c128_5, %c0_6] : memref<224x128xf32, #tpu.memory_space<vmem>>, vector<32x64xf32>
    %c160 = arith.constant 160 : index
    %c0_7 = arith.constant 0 : index
    %12 = vector.load %arg2[%c160, %c0_7] : memref<224x128xf32, #tpu.memory_space<vmem>>, vector<64x32xf32>
    %c408 = arith.constant 408 : index
    %c0_8 = arith.constant 0 : index
    %13 = vector.load %arg1[%c408, %c0_8] : memref<696x32xf32, #tpu.memory_space<vmem>>, vector<1x32xf32>
    %c409 = arith.constant 409 : index
    %c0_9 = arith.constant 0 : index
    %14 = vector.load %arg1[%c409, %c0_9] : memref<696x32xf32, #tpu.memory_space<vmem>>, vector<1x32xf32>
    %cst_10 = arith.constant dense<0.000000e+00> : vector<16xf32>
    %15 = vector.multi_reduction <add>, %9, %cst_10 [1] : vector<16x32xf32> to vector<16xf32>
    %16 = vector.shape_cast %15 : vector<16xf32> to vector<16x1xf32>
    %cst_11 = arith.constant 3.200000e+01 : f32
    %17 = vector.broadcast %cst_11 : f32 to vector<16x1xf32>
    %18 = arith.divf %16, %17 : vector<16x1xf32>
    %19 = vector.broadcast %18 : vector<16x1xf32> to vector<16x32xf32>
    %20 = arith.subf %9, %19 : vector<16x32xf32>
    %21 = arith.mulf %20, %20 : vector<16x32xf32>
    %cst_12 = arith.constant dense<0.000000e+00> : vector<16xf32>
    %22 = vector.multi_reduction <add>, %21, %cst_12 [1] : vector<16x32xf32> to vector<16xf32>
    %23 = vector.shape_cast %22 : vector<16xf32> to vector<16x1xf32>
    %cst_13 = arith.constant 3.200000e+01 : f32
    %24 = vector.broadcast %cst_13 : f32 to vector<16x1xf32>
    %25 = arith.divf %23, %24 : vector<16x1xf32>
    %26 = vector.broadcast %18 : vector<16x1xf32> to vector<16x32xf32>
    %27 = arith.subf %9, %26 : vector<16x32xf32>
    %cst_14 = arith.constant 9.99999974E-6 : f32
    %28 = vector.broadcast %cst_14 : f32 to vector<16x1xf32>
    %29 = arith.addf %25, %28 : vector<16x1xf32>
    %30 = math.rsqrt %29 : vector<16x1xf32>
    %31 = vector.broadcast %30 : vector<16x1xf32> to vector<16x32xf32>
    %32 = arith.mulf %27, %31 : vector<16x32xf32>
    %33 = vector.broadcast %13 : vector<1x32xf32> to vector<16x32xf32>
    %34 = arith.mulf %32, %33 : vector<16x32xf32>
    %35 = vector.broadcast %14 : vector<1x32xf32> to vector<16x32xf32>
    %36 = arith.addf %34, %35 : vector<16x32xf32>
    %c152 = arith.constant 152 : index
    %c0_15 = arith.constant 0 : index
    %37 = vector.load %arg1[%c152, %c0_15] : memref<696x32xf32, #tpu.memory_space<vmem>>, vector<32x32xf32>
    %cst_16 = arith.constant dense<0.000000e+00> : vector<16x32xf32>
    %38 = tpu.matmul %36, %37, %cst_16 {dimension_numbers = #tpu.dot_dimension_numbers<[1], [0], [0], [1], [0, 0, 1, 1], [], []>} : vector<16x32xf32>, vector<32x32xf32>, vector<16x32xf32> -> vector<16x32xf32>
    %c412 = arith.constant 412 : index
    %c0_17 = arith.constant 0 : index
    %39 = vector.load %arg1[%c412, %c0_17] : memref<696x32xf32, #tpu.memory_space<vmem>>, vector<1x32xf32>
    %40 = vector.broadcast %39 : vector<1x32xf32> to vector<16x32xf32>
    %41 = arith.addf %38, %40 : vector<16x32xf32>
    %c184 = arith.constant 184 : index
    %c0_18 = arith.constant 0 : index
    %42 = vector.load %arg1[%c184, %c0_18] : memref<696x32xf32, #tpu.memory_space<vmem>>, vector<32x32xf32>
    %cst_19 = arith.constant dense<0.000000e+00> : vector<16x32xf32>
    %43 = tpu.matmul %36, %42, %cst_19 {dimension_numbers = #tpu.dot_dimension_numbers<[1], [0], [0], [1], [0, 0, 1, 1], [], []>} : vector<16x32xf32>, vector<32x32xf32>, vector<16x32xf32> -> vector<16x32xf32>
    %c413 = arith.constant 413 : index
    %c0_20 = arith.constant 0 : index
    %44 = vector.load %arg1[%c413, %c0_20] : memref<696x32xf32, #tpu.memory_space<vmem>>, vector<1x32xf32>
    %45 = vector.broadcast %44 : vector<1x32xf32> to vector<16x32xf32>
    %46 = arith.addf %43, %45 : vector<16x32xf32>
    %c216 = arith.constant 216 : index
    %c0_21 = arith.constant 0 : index
    %47 = vector.load %arg1[%c216, %c0_21] : memref<696x32xf32, #tpu.memory_space<vmem>>, vector<32x32xf32>
    %cst_22 = arith.constant dense<0.000000e+00> : vector<16x32xf32>
    %48 = tpu.matmul %36, %47, %cst_22 {dimension_numbers = #tpu.dot_dimension_numbers<[1], [0], [0], [1], [0, 0, 1, 1], [], []>} : vector<16x32xf32>, vector<32x32xf32>, vector<16x32xf32> -> vector<16x32xf32>
    %c414 = arith.constant 414 : index
    %c0_23 = arith.constant 0 : index
    %49 = vector.load %arg1[%c414, %c0_23] : memref<696x32xf32, #tpu.memory_space<vmem>>, vector<1x32xf32>
    %50 = vector.broadcast %49 : vector<1x32xf32> to vector<16x32xf32>
    %51 = arith.addf %48, %50 : vector<16x32xf32>
    %52 = tpu.transpose %46, [1, 0] : vector<16x32xf32> -> vector<32x16xf32>
    %53 = tpu.concatenate %52, %52, %52, %52 in 1 : vector<32x16xf32>, vector<32x16xf32>, vector<32x16xf32>, vector<32x16xf32> -> vector<32x64xf32>
    %54 = arith.mulf %53, %11 : vector<32x64xf32>
    %cst_24 = arith.constant dense<0.000000e+00> : vector<16x64xf32>
    %55 = tpu.matmul %41, %54, %cst_24 {dimension_numbers = #tpu.dot_dimension_numbers<[1], [0], [0], [1], [0, 0, 1, 1], [], []>} : vector<16x32xf32>, vector<32x64xf32>, vector<16x64xf32> -> vector<16x64xf32>
    %56 = arith.addf %55, %10 : vector<16x64xf32>
    %cst_25 = arith.constant dense<0xFF800000> : vector<16xf32>
    %57 = vector.multi_reduction <maximumf>, %56, %cst_25 [1] : vector<16x64xf32> to vector<16xf32>
    %58 = vector.shape_cast %57 : vector<16xf32> to vector<16x1xf32>
    %59 = vector.broadcast %58 : vector<16x1xf32> to vector<16x64xf32>
    %60 = arith.subf %56, %59 : vector<16x64xf32>
    %61 = math.exp %60 : vector<16x64xf32>
    %62 = tpu.concatenate %51, %51, %51, %51 in 0 : vector<16x32xf32>, vector<16x32xf32>, vector<16x32xf32>, vector<16x32xf32> -> vector<64x32xf32>
    %63 = arith.mulf %62, %12 : vector<64x32xf32>
    %cst_26 = arith.constant dense<0.000000e+00> : vector<16x32xf32>
    %64 = tpu.matmul %61, %63, %cst_26 {dimension_numbers = #tpu.dot_dimension_numbers<[1], [0], [0], [1], [0, 0, 1, 1], [], []>} : vector<16x64xf32>, vector<64x32xf32>, vector<16x32xf32> -> vector<16x32xf32>
    %cst_27 = arith.constant dense<0.000000e+00> : vector<16x32xf32>
    %65 = tpu.matmul %61, %12, %cst_27 {dimension_numbers = #tpu.dot_dimension_numbers<[1], [0], [0], [1], [0, 0, 1, 1], [], []>} : vector<16x64xf32>, vector<64x32xf32>, vector<16x32xf32> -> vector<16x32xf32>
    %66 = tpu.reciprocal %65 {approx = true} : vector<16x32xf32> -> vector<16x32xf32>
    %67 = arith.mulf %64, %66 : vector<16x32xf32>
    %c248 = arith.constant 248 : index
    %c0_28 = arith.constant 0 : index
    %68 = vector.load %arg1[%c248, %c0_28] : memref<696x32xf32, #tpu.memory_space<vmem>>, vector<32x32xf32>
    %cst_29 = arith.constant dense<0.000000e+00> : vector<16x32xf32>
    %69 = tpu.matmul %67, %68, %cst_29 {dimension_numbers = #tpu.dot_dimension_numbers<[1], [0], [0], [1], [0, 0, 1, 1], [], []>} : vector<16x32xf32>, vector<32x32xf32>, vector<16x32xf32> -> vector<16x32xf32>
    %c415 = arith.constant 415 : index
    %c0_30 = arith.constant 0 : index
    %70 = vector.load %arg1[%c415, %c0_30] : memref<696x32xf32, #tpu.memory_space<vmem>>, vector<1x32xf32>
    %71 = vector.broadcast %70 : vector<1x32xf32> to vector<16x32xf32>
    %72 = arith.addf %69, %71 : vector<16x32xf32>
    %73 = arith.addf %9, %72 : vector<16x32xf32>
    %c410 = arith.constant 410 : index
    %c0_31 = arith.constant 0 : index
    %74 = vector.load %arg1[%c410, %c0_31] : memref<696x32xf32, #tpu.memory_space<vmem>>, vector<1x32xf32>
    %c411 = arith.constant 411 : index
    %c0_32 = arith.constant 0 : index
    %75 = vector.load %arg1[%c411, %c0_32] : memref<696x32xf32, #tpu.memory_space<vmem>>, vector<1x32xf32>
    %cst_33 = arith.constant dense<0.000000e+00> : vector<16xf32>
    %76 = vector.multi_reduction <add>, %73, %cst_33 [1] : vector<16x32xf32> to vector<16xf32>
    %77 = vector.shape_cast %76 : vector<16xf32> to vector<16x1xf32>
    %cst_34 = arith.constant 3.200000e+01 : f32
    %78 = vector.broadcast %cst_34 : f32 to vector<16x1xf32>
    %79 = arith.divf %77, %78 : vector<16x1xf32>
    %80 = vector.broadcast %79 : vector<16x1xf32> to vector<16x32xf32>
    %81 = arith.subf %73, %80 : vector<16x32xf32>
    %82 = arith.mulf %81, %81 : vector<16x32xf32>
    %cst_35 = arith.constant dense<0.000000e+00> : vector<16xf32>
    %83 = vector.multi_reduction <add>, %82, %cst_35 [1] : vector<16x32xf32> to vector<16xf32>
    %84 = vector.shape_cast %83 : vector<16xf32> to vector<16x1xf32>
    %cst_36 = arith.constant 3.200000e+01 : f32
    %85 = vector.broadcast %cst_36 : f32 to vector<16x1xf32>
    %86 = arith.divf %84, %85 : vector<16x1xf32>
    %87 = vector.broadcast %79 : vector<16x1xf32> to vector<16x32xf32>
    %88 = arith.subf %73, %87 : vector<16x32xf32>
    %cst_37 = arith.constant 9.99999974E-6 : f32
    %89 = vector.broadcast %cst_37 : f32 to vector<16x1xf32>
    %90 = arith.addf %86, %89 : vector<16x1xf32>
    %91 = math.rsqrt %90 : vector<16x1xf32>
    %92 = vector.broadcast %91 : vector<16x1xf32> to vector<16x32xf32>
    %93 = arith.mulf %88, %92 : vector<16x32xf32>
    %94 = vector.broadcast %74 : vector<1x32xf32> to vector<16x32xf32>
    %95 = arith.mulf %93, %94 : vector<16x32xf32>
    %96 = vector.broadcast %75 : vector<1x32xf32> to vector<16x32xf32>
    %97 = arith.addf %95, %96 : vector<16x32xf32>
    %c0_38 = arith.constant 0 : index
    %c0_39 = arith.constant 0 : index
    %98 = vector.load %arg2[%c0_38, %c0_39] : memref<224x128xf32, #tpu.memory_space<vmem>>, vector<32x128xf32>
    %cst_40 = arith.constant dense<0.000000e+00> : vector<16x128xf32>
    %99 = tpu.matmul %97, %98, %cst_40 {dimension_numbers = #tpu.dot_dimension_numbers<[1], [0], [0], [1], [0, 0, 1, 1], [], []>} : vector<16x32xf32>, vector<32x128xf32>, vector<16x128xf32> -> vector<16x128xf32>
    %c32 = arith.constant 32 : index
    %c0_41 = arith.constant 0 : index
    %100 = vector.load %arg2[%c32, %c0_41] : memref<224x128xf32, #tpu.memory_space<vmem>>, vector<1x128xf32>
    %101 = vector.broadcast %100 : vector<1x128xf32> to vector<16x128xf32>
    %102 = arith.addf %99, %101 : vector<16x128xf32>
    %cst_42 = arith.constant 5.000000e-01 : f32
    %103 = vector.broadcast %cst_42 : f32 to vector<16x128xf32>
    %104 = arith.mulf %103, %102 : vector<16x128xf32>
    %cst_43 = arith.constant 4.471500e-02 : f32
    %105 = vector.broadcast %cst_43 : f32 to vector<16x128xf32>
    %106 = arith.mulf %105, %102 : vector<16x128xf32>
    %107 = arith.mulf %106, %102 : vector<16x128xf32>
    %108 = arith.mulf %107, %102 : vector<16x128xf32>
    %109 = arith.addf %102, %108 : vector<16x128xf32>
    %cst_44 = arith.constant 0.797884583 : f32
    %110 = vector.broadcast %cst_44 : f32 to vector<16x128xf32>
    %111 = arith.mulf %110, %109 : vector<16x128xf32>
    %112 = math.tanh %111 : vector<16x128xf32>
    %cst_45 = arith.constant 1.000000e+00 : f32
    %113 = vector.broadcast %cst_45 : f32 to vector<16x128xf32>
    %114 = arith.addf %113, %112 : vector<16x128xf32>
    %115 = arith.mulf %104, %114 : vector<16x128xf32>
    %c280 = arith.constant 280 : index
    %c0_46 = arith.constant 0 : index
    %116 = vector.load %arg1[%c280, %c0_46] : memref<696x32xf32, #tpu.memory_space<vmem>>, vector<128x32xf32>
    %cst_47 = arith.constant dense<0.000000e+00> : vector<16x32xf32>
    %117 = tpu.matmul %115, %116, %cst_47 {dimension_numbers = #tpu.dot_dimension_numbers<[1], [0], [0], [1], [0, 0, 1, 1], [], []>} : vector<16x128xf32>, vector<128x32xf32>, vector<16x32xf32> -> vector<16x32xf32>
    %c416 = arith.constant 416 : index
    %c0_48 = arith.constant 0 : index
    %118 = vector.load %arg1[%c416, %c0_48] : memref<696x32xf32, #tpu.memory_space<vmem>>, vector<1x32xf32>
    %119 = vector.broadcast %118 : vector<1x32xf32> to vector<16x32xf32>
    %120 = arith.addf %117, %119 : vector<16x32xf32>
    %121 = arith.addf %73, %120 : vector<16x32xf32>
    %c680 = arith.constant 680 : index
    %c0_49 = arith.constant 0 : index
    %122 = vector.load %arg1[%c680, %c0_49] : memref<696x32xf32, #tpu.memory_space<vmem>>, vector<1x32xf32>
    %c681 = arith.constant 681 : index
    %c0_50 = arith.constant 0 : index
    %123 = vector.load %arg1[%c681, %c0_50] : memref<696x32xf32, #tpu.memory_space<vmem>>, vector<1x32xf32>
    %cst_51 = arith.constant dense<0.000000e+00> : vector<16xf32>
    %124 = vector.multi_reduction <add>, %121, %cst_51 [1] : vector<16x32xf32> to vector<16xf32>
    %125 = vector.shape_cast %124 : vector<16xf32> to vector<16x1xf32>
    %cst_52 = arith.constant 3.200000e+01 : f32
    %126 = vector.broadcast %cst_52 : f32 to vector<16x1xf32>
    %127 = arith.divf %125, %126 : vector<16x1xf32>
    %128 = vector.broadcast %127 : vector<16x1xf32> to vector<16x32xf32>
    %129 = arith.subf %121, %128 : vector<16x32xf32>
    %130 = arith.mulf %129, %129 : vector<16x32xf32>
    %cst_53 = arith.constant dense<0.000000e+00> : vector<16xf32>
    %131 = vector.multi_reduction <add>, %130, %cst_53 [1] : vector<16x32xf32> to vector<16xf32>
    %132 = vector.shape_cast %131 : vector<16xf32> to vector<16x1xf32>
    %cst_54 = arith.constant 3.200000e+01 : f32
    %133 = vector.broadcast %cst_54 : f32 to vector<16x1xf32>
    %134 = arith.divf %132, %133 : vector<16x1xf32>
    %135 = vector.broadcast %127 : vector<16x1xf32> to vector<16x32xf32>
    %136 = arith.subf %121, %135 : vector<16x32xf32>
    %cst_55 = arith.constant 9.99999974E-6 : f32
    %137 = vector.broadcast %cst_55 : f32 to vector<16x1xf32>
    %138 = arith.addf %134, %137 : vector<16x1xf32>
    %139 = math.rsqrt %138 : vector<16x1xf32>
    %140 = vector.broadcast %139 : vector<16x1xf32> to vector<16x32xf32>
    %141 = arith.mulf %136, %140 : vector<16x32xf32>
    %142 = vector.broadcast %122 : vector<1x32xf32> to vector<16x32xf32>
    %143 = arith.mulf %141, %142 : vector<16x32xf32>
    %144 = vector.broadcast %123 : vector<1x32xf32> to vector<16x32xf32>
    %145 = arith.addf %143, %144 : vector<16x32xf32>
    %c424 = arith.constant 424 : index
    %c0_56 = arith.constant 0 : index
    %146 = vector.load %arg1[%c424, %c0_56] : memref<696x32xf32, #tpu.memory_space<vmem>>, vector<32x32xf32>
    %cst_57 = arith.constant dense<0.000000e+00> : vector<16x32xf32>
    %147 = tpu.matmul %145, %146, %cst_57 {dimension_numbers = #tpu.dot_dimension_numbers<[1], [0], [0], [1], [0, 0, 1, 1], [], []>} : vector<16x32xf32>, vector<32x32xf32>, vector<16x32xf32> -> vector<16x32xf32>
    %c684 = arith.constant 684 : index
    %c0_58 = arith.constant 0 : index
    %148 = vector.load %arg1[%c684, %c0_58] : memref<696x32xf32, #tpu.memory_space<vmem>>, vector<1x32xf32>
    %149 = vector.broadcast %148 : vector<1x32xf32> to vector<16x32xf32>
    %150 = arith.addf %147, %149 : vector<16x32xf32>
    %c456 = arith.constant 456 : index
    %c0_59 = arith.constant 0 : index
    %151 = vector.load %arg1[%c456, %c0_59] : memref<696x32xf32, #tpu.memory_space<vmem>>, vector<32x32xf32>
    %cst_60 = arith.constant dense<0.000000e+00> : vector<16x32xf32>
    %152 = tpu.matmul %145, %151, %cst_60 {dimension_numbers = #tpu.dot_dimension_numbers<[1], [0], [0], [1], [0, 0, 1, 1], [], []>} : vector<16x32xf32>, vector<32x32xf32>, vector<16x32xf32> -> vector<16x32xf32>
    %c685 = arith.constant 685 : index
    %c0_61 = arith.constant 0 : index
    %153 = vector.load %arg1[%c685, %c0_61] : memref<696x32xf32, #tpu.memory_space<vmem>>, vector<1x32xf32>
    %154 = vector.broadcast %153 : vector<1x32xf32> to vector<16x32xf32>
    %155 = arith.addf %152, %154 : vector<16x32xf32>
    %c488 = arith.constant 488 : index
    %c0_62 = arith.constant 0 : index
    %156 = vector.load %arg1[%c488, %c0_62] : memref<696x32xf32, #tpu.memory_space<vmem>>, vector<32x32xf32>
    %cst_63 = arith.constant dense<0.000000e+00> : vector<16x32xf32>
    %157 = tpu.matmul %145, %156, %cst_63 {dimension_numbers = #tpu.dot_dimension_numbers<[1], [0], [0], [1], [0, 0, 1, 1], [], []>} : vector<16x32xf32>, vector<32x32xf32>, vector<16x32xf32> -> vector<16x32xf32>
    %c686 = arith.constant 686 : index
    %c0_64 = arith.constant 0 : index
    %158 = vector.load %arg1[%c686, %c0_64] : memref<696x32xf32, #tpu.memory_space<vmem>>, vector<1x32xf32>
    %159 = vector.broadcast %158 : vector<1x32xf32> to vector<16x32xf32>
    %160 = arith.addf %157, %159 : vector<16x32xf32>
    %161 = tpu.transpose %155, [1, 0] : vector<16x32xf32> -> vector<32x16xf32>
    %162 = tpu.concatenate %161, %161, %161, %161 in 1 : vector<32x16xf32>, vector<32x16xf32>, vector<32x16xf32>, vector<32x16xf32> -> vector<32x64xf32>
    %163 = arith.mulf %162, %11 : vector<32x64xf32>
    %cst_65 = arith.constant dense<0.000000e+00> : vector<16x64xf32>
    %164 = tpu.matmul %150, %163, %cst_65 {dimension_numbers = #tpu.dot_dimension_numbers<[1], [0], [0], [1], [0, 0, 1, 1], [], []>} : vector<16x32xf32>, vector<32x64xf32>, vector<16x64xf32> -> vector<16x64xf32>
    %165 = arith.addf %164, %10 : vector<16x64xf32>
    %cst_66 = arith.constant dense<0xFF800000> : vector<16xf32>
    %166 = vector.multi_reduction <maximumf>, %165, %cst_66 [1] : vector<16x64xf32> to vector<16xf32>
    %167 = vector.shape_cast %166 : vector<16xf32> to vector<16x1xf32>
    %168 = vector.broadcast %167 : vector<16x1xf32> to vector<16x64xf32>
    %169 = arith.subf %165, %168 : vector<16x64xf32>
    %170 = math.exp %169 : vector<16x64xf32>
    %171 = tpu.concatenate %160, %160, %160, %160 in 0 : vector<16x32xf32>, vector<16x32xf32>, vector<16x32xf32>, vector<16x32xf32> -> vector<64x32xf32>
    %172 = arith.mulf %171, %12 : vector<64x32xf32>
    %cst_67 = arith.constant dense<0.000000e+00> : vector<16x32xf32>
    %173 = tpu.matmul %170, %172, %cst_67 {dimension_numbers = #tpu.dot_dimension_numbers<[1], [0], [0], [1], [0, 0, 1, 1], [], []>} : vector<16x64xf32>, vector<64x32xf32>, vector<16x32xf32> -> vector<16x32xf32>
    %cst_68 = arith.constant dense<0.000000e+00> : vector<16x32xf32>
    %174 = tpu.matmul %170, %12, %cst_68 {dimension_numbers = #tpu.dot_dimension_numbers<[1], [0], [0], [1], [0, 0, 1, 1], [], []>} : vector<16x64xf32>, vector<64x32xf32>, vector<16x32xf32> -> vector<16x32xf32>
    %175 = tpu.reciprocal %174 {approx = true} : vector<16x32xf32> -> vector<16x32xf32>
    %176 = arith.mulf %173, %175 : vector<16x32xf32>
    %c520 = arith.constant 520 : index
    %c0_69 = arith.constant 0 : index
    %177 = vector.load %arg1[%c520, %c0_69] : memref<696x32xf32, #tpu.memory_space<vmem>>, vector<32x32xf32>
    %cst_70 = arith.constant dense<0.000000e+00> : vector<16x32xf32>
    %178 = tpu.matmul %176, %177, %cst_70 {dimension_numbers = #tpu.dot_dimension_numbers<[1], [0], [0], [1], [0, 0, 1, 1], [], []>} : vector<16x32xf32>, vector<32x32xf32>, vector<16x32xf32> -> vector<16x32xf32>
    %c687 = arith.constant 687 : index
    %c0_71 = arith.constant 0 : index
    %179 = vector.load %arg1[%c687, %c0_71] : memref<696x32xf32, #tpu.memory_space<vmem>>, vector<1x32xf32>
    %180 = vector.broadcast %179 : vector<1x32xf32> to vector<16x32xf32>
    %181 = arith.addf %178, %180 : vector<16x32xf32>
    %182 = arith.addf %121, %181 : vector<16x32xf32>
    %c682 = arith.constant 682 : index
    %c0_72 = arith.constant 0 : index
    %183 = vector.load %arg1[%c682, %c0_72] : memref<696x32xf32, #tpu.memory_space<vmem>>, vector<1x32xf32>
    %c683 = arith.constant 683 : index
    %c0_73 = arith.constant 0 : index
    %184 = vector.load %arg1[%c683, %c0_73] : memref<696x32xf32, #tpu.memory_space<vmem>>, vector<1x32xf32>
    %cst_74 = arith.constant dense<0.000000e+00> : vector<16xf32>
    %185 = vector.multi_reduction <add>, %182, %cst_74 [1] : vector<16x32xf32> to vector<16xf32>
    %186 = vector.shape_cast %185 : vector<16xf32> to vector<16x1xf32>
    %cst_75 = arith.constant 3.200000e+01 : f32
    %187 = vector.broadcast %cst_75 : f32 to vector<16x1xf32>
    %188 = arith.divf %186, %187 : vector<16x1xf32>
    %189 = vector.broadcast %188 : vector<16x1xf32> to vector<16x32xf32>
    %190 = arith.subf %182, %189 : vector<16x32xf32>
    %191 = arith.mulf %190, %190 : vector<16x32xf32>
    %cst_76 = arith.constant dense<0.000000e+00> : vector<16xf32>
    %192 = vector.multi_reduction <add>, %191, %cst_76 [1] : vector<16x32xf32> to vector<16xf32>
    %193 = vector.shape_cast %192 : vector<16xf32> to vector<16x1xf32>
    %cst_77 = arith.constant 3.200000e+01 : f32
    %194 = vector.broadcast %cst_77 : f32 to vector<16x1xf32>
    %195 = arith.divf %193, %194 : vector<16x1xf32>
    %196 = vector.broadcast %188 : vector<16x1xf32> to vector<16x32xf32>
    %197 = arith.subf %182, %196 : vector<16x32xf32>
    %cst_78 = arith.constant 9.99999974E-6 : f32
    %198 = vector.broadcast %cst_78 : f32 to vector<16x1xf32>
    %199 = arith.addf %195, %198 : vector<16x1xf32>
    %200 = math.rsqrt %199 : vector<16x1xf32>
    %201 = vector.broadcast %200 : vector<16x1xf32> to vector<16x32xf32>
    %202 = arith.mulf %197, %201 : vector<16x32xf32>
    %203 = vector.broadcast %183 : vector<1x32xf32> to vector<16x32xf32>
    %204 = arith.mulf %202, %203 : vector<16x32xf32>
    %205 = vector.broadcast %184 : vector<1x32xf32> to vector<16x32xf32>
    %206 = arith.addf %204, %205 : vector<16x32xf32>
    %c40 = arith.constant 40 : index
    %c0_79 = arith.constant 0 : index
    %207 = vector.load %arg2[%c40, %c0_79] : memref<224x128xf32, #tpu.memory_space<vmem>>, vector<32x128xf32>
    %cst_80 = arith.constant dense<0.000000e+00> : vector<16x128xf32>
    %208 = tpu.matmul %206, %207, %cst_80 {dimension_numbers = #tpu.dot_dimension_numbers<[1], [0], [0], [1], [0, 0, 1, 1], [], []>} : vector<16x32xf32>, vector<32x128xf32>, vector<16x128xf32> -> vector<16x128xf32>
    %c72 = arith.constant 72 : index
    %c0_81 = arith.constant 0 : index
    %209 = vector.load %arg2[%c72, %c0_81] : memref<224x128xf32, #tpu.memory_space<vmem>>, vector<1x128xf32>
    %210 = vector.broadcast %209 : vector<1x128xf32> to vector<16x128xf32>
    %211 = arith.addf %208, %210 : vector<16x128xf32>
    %cst_82 = arith.constant 5.000000e-01 : f32
    %212 = vector.broadcast %cst_82 : f32 to vector<16x128xf32>
    %213 = arith.mulf %212, %211 : vector<16x128xf32>
    %cst_83 = arith.constant 4.471500e-02 : f32
    %214 = vector.broadcast %cst_83 : f32 to vector<16x128xf32>
    %215 = arith.mulf %214, %211 : vector<16x128xf32>
    %216 = arith.mulf %215, %211 : vector<16x128xf32>
    %217 = arith.mulf %216, %211 : vector<16x128xf32>
    %218 = arith.addf %211, %217 : vector<16x128xf32>
    %cst_84 = arith.constant 0.797884583 : f32
    %219 = vector.broadcast %cst_84 : f32 to vector<16x128xf32>
    %220 = arith.mulf %219, %218 : vector<16x128xf32>
    %221 = math.tanh %220 : vector<16x128xf32>
    %cst_85 = arith.constant 1.000000e+00 : f32
    %222 = vector.broadcast %cst_85 : f32 to vector<16x128xf32>
    %223 = arith.addf %222, %221 : vector<16x128xf32>
    %224 = arith.mulf %213, %223 : vector<16x128xf32>
    %c552 = arith.constant 552 : index
    %c0_86 = arith.constant 0 : index
    %225 = vector.load %arg1[%c552, %c0_86] : memref<696x32xf32, #tpu.memory_space<vmem>>, vector<128x32xf32>
    %cst_87 = arith.constant dense<0.000000e+00> : vector<16x32xf32>
    %226 = tpu.matmul %224, %225, %cst_87 {dimension_numbers = #tpu.dot_dimension_numbers<[1], [0], [0], [1], [0, 0, 1, 1], [], []>} : vector<16x128xf32>, vector<128x32xf32>, vector<16x32xf32> -> vector<16x32xf32>
    %c688 = arith.constant 688 : index
    %c0_88 = arith.constant 0 : index
    %227 = vector.load %arg1[%c688, %c0_88] : memref<696x32xf32, #tpu.memory_space<vmem>>, vector<1x32xf32>
    %228 = vector.broadcast %227 : vector<1x32xf32> to vector<16x32xf32>
    %229 = arith.addf %226, %228 : vector<16x32xf32>
    %230 = arith.addf %182, %229 : vector<16x32xf32>
    %c144 = arith.constant 144 : index
    %c0_89 = arith.constant 0 : index
    %231 = vector.load %arg1[%c144, %c0_89] : memref<696x32xf32, #tpu.memory_space<vmem>>, vector<1x32xf32>
    %c145 = arith.constant 145 : index
    %c0_90 = arith.constant 0 : index
    %232 = vector.load %arg1[%c145, %c0_90] : memref<696x32xf32, #tpu.memory_space<vmem>>, vector<1x32xf32>
    %cst_91 = arith.constant dense<0.000000e+00> : vector<16xf32>
    %233 = vector.multi_reduction <add>, %230, %cst_91 [1] : vector<16x32xf32> to vector<16xf32>
    %234 = vector.shape_cast %233 : vector<16xf32> to vector<16x1xf32>
    %cst_92 = arith.constant 3.200000e+01 : f32
    %235 = vector.broadcast %cst_92 : f32 to vector<16x1xf32>
    %236 = arith.divf %234, %235 : vector<16x1xf32>
    %237 = vector.broadcast %236 : vector<16x1xf32> to vector<16x32xf32>
    %238 = arith.subf %230, %237 : vector<16x32xf32>
    %239 = arith.mulf %238, %238 : vector<16x32xf32>
    %cst_93 = arith.constant dense<0.000000e+00> : vector<16xf32>
    %240 = vector.multi_reduction <add>, %239, %cst_93 [1] : vector<16x32xf32> to vector<16xf32>
    %241 = vector.shape_cast %240 : vector<16xf32> to vector<16x1xf32>
    %cst_94 = arith.constant 3.200000e+01 : f32
    %242 = vector.broadcast %cst_94 : f32 to vector<16x1xf32>
    %243 = arith.divf %241, %242 : vector<16x1xf32>
    %244 = vector.broadcast %236 : vector<16x1xf32> to vector<16x32xf32>
    %245 = arith.subf %230, %244 : vector<16x32xf32>
    %cst_95 = arith.constant 9.99999974E-6 : f32
    %246 = vector.broadcast %cst_95 : f32 to vector<16x1xf32>
    %247 = arith.addf %243, %246 : vector<16x1xf32>
    %248 = math.rsqrt %247 : vector<16x1xf32>
    %249 = vector.broadcast %248 : vector<16x1xf32> to vector<16x32xf32>
    %250 = arith.mulf %245, %249 : vector<16x32xf32>
    %251 = vector.broadcast %231 : vector<1x32xf32> to vector<16x32xf32>
    %252 = arith.mulf %250, %251 : vector<16x32xf32>
    %253 = vector.broadcast %232 : vector<1x32xf32> to vector<16x32xf32>
    %254 = arith.addf %252, %253 : vector<16x32xf32>
    %c80 = arith.constant 80 : index
    %c0_96 = arith.constant 0 : index
    %255 = vector.load %arg2[%c80, %c0_96] : memref<224x128xf32, #tpu.memory_space<vmem>>, vector<32x128xf32>
    %cst_97 = arith.constant dense<0.000000e+00> : vector<16x128xf32>
    %256 = tpu.matmul %254, %255, %cst_97 {dimension_numbers = #tpu.dot_dimension_numbers<[1], [0], [0], [1], [0, 0, 1, 1], [], []>} : vector<16x32xf32>, vector<32x128xf32>, vector<16x128xf32> -> vector<16x128xf32>
    %c0_98 = arith.constant 0 : index
    %c0_99 = arith.constant 0 : index
    %257 = vector.load %arg3[%c0_98, %c0_99] : memref<16x128xf32, #tpu.memory_space<vmem>>, vector<16x128xf32>
    tpu.vector_store %arg3[%c0_98, %c0_99], %256 {strides = array<i32>} : memref<16x128xf32, #tpu.memory_space<vmem>>, vector<16x128xf32>,
    return
  }
}

</mosaic_0001>

<bundles_post_ra>
// kernel: tpu_custom_call.1
= control target key start
LH: loop header
LB: loop body
LE: loop exit
PB: predicated region body
PF: predicated region fallthrough
CT: control target
= control target key end

     0   :  { %v3154_v2 = vmov 0   ;;  %s3846_s0 = inlined_call_operand.vmem [shape: s32[16,1], index: 0, kind: input, shape index: {}]   ;;  %s3847_s1 = inlined_call_operand.vmem [shape: f32[696,32], index: 1, kind: input, shape index: {}]   ;;  %s3848_s2 = inlined_call_operand.vmem [shape: f32[224,128], index: 2, kind: input, shape index: {}]   ;;  %s3849_s3 = inlined_call_operand.hbm [shape: f32[16,128], index: 3, kind: output, shape index: {}]  }
   0x1   :  { %v15_v0 = vld [vmem:[%s3846_s0] sm:$0xff]  ;;  %3085 = vset.pattern.permute.xlu0 %v3154_v2  ;;  %v32_v3 = vld [vmem:[%s3847_s1 + $0x8] sm:$0xff]  ;;  %v33_v4 = vld [vmem:[%s3847_s1 + $0x10] sm:$0xff] }
   0x2   :  { %v31_v1 = vld [vmem:[%s3847_s1] sm:$0xff]  ;;  %v34_v5 = vld [vmem:[%s3847_s1 + $0x18] sm:$0xff]  ;;  %20 = vperm.xlu0 %3085, %v15_v0   ;;  %v16_v8 = vld [vmem:[%s3846_s0 + $0x8] sm:$0xff] }
   0x3   :  { %v2812_v6 = vpack.c.bf16 %v32_v3, %v31_v1  ;;  %v2816_v7 = vpack.c.bf16 %v34_v5, %v33_v4  ;;  %v35_v9 = vld [vmem:[%s3847_s1 + $0x20] sm:$0xff]  ;;  %v36_v10 = vld [vmem:[%s3847_s1 + $0x28] sm:$0xff] }
   0x4   :  { %v2820_v11 = vpack.c.bf16 %v36_v10, %v35_v9 }
   0x5   :  { %2813 = vmatprep.subr.bf16.mxu0 %v2812_v6 }
   0x6   :  { %2815 = vmatpush3.bf16.msra.mxu0 %v2812_v6  ;;  %23 = vperm.xlu0 %3085, %v16_v8  }
   0x7   :  { %2817 = vmatprep.subr.bf16.mxu0 %v2816_v7 }
   0x8   :  { %8 = vsyncpa [#allocation3], 0  ;;  %v37_v12 = vld [vmem:[%s3847_s1 + $0x30] sm:$0xff]  ;;  %v38_v13 = vld [vmem:[%s3847_s1 + $0x38] sm:$0xff]  ;;  %v17_v27 = vlaneseq  ;;  %v3155_v30 = vmov 1.0   ;;  %vm140_vm2 = vcmask 261120  }
   0x9   :  { %v2824_v14 = vpack.c.bf16 %v38_v13, %v37_v12  ;;  %v39_v15 = vld [vmem:[%s3847_s1 + $0x40] sm:$0xff]  ;;  %v40_v16 = vld [vmem:[%s3847_s1 + $0x48] sm:$0xff]  ;;  %v41_v18 = vld [vmem:[%s3847_s1 + $0x50] sm:$0xff]  ;;  %s3156_s18 = smov 16   ;;  %s3157_s19 = smov 32   ;;  %vm510_vm3 = vcmask 130048  }
   0xa   :  { %2819 = vmatpush3.bf16.msra.mxu0 %v2816_v7  ;;  %v2828_v17 = vpack.c.bf16 %v40_v16, %v39_v15  ;;  %v42_v19 = vld [vmem:[%s3847_s1 + $0x58] sm:$0xff]  ;;  %v43_v21 = vld [vmem:[%s3847_s1 + $0x60] sm:$0xff]  ;;  %v44_v22 = vld [vmem:[%s3847_s1 + $0x68] sm:$0xff]  ;;  %v18_v28 = vand.u32 127, %v17_v27  ;;  %s3158_s20 = smov 48   ;;  %vm519_vm4 = vcmask 392192  }
   0xb   :  { %2821 = vmatprep.subr.bf16.mxu0 %v2820_v11  ;;  %v2832_v20 = vpack.c.bf16 %v42_v19, %v41_v18  ;;  %v2836_v23 = vpack.c.bf16 %v44_v22, %v43_v21  ;;  %v45_v24 = vld [vmem:[%s3847_s1 + $0x70] sm:$0xff]  ;;  %v46_v25 = vld [vmem:[%s3847_s1 + $0x78] sm:$0xff]  ;;  %v47_v32 = vld [vmem:[%s3847_s1 + $0x80] sm:$0xff]  ;;  %vm609_vm5 = vcmask 523264  }
   0xc   :  { %v2840_v26 = vpack.c.bf16 %v46_v25, %v45_v24  ;;  %v48_v34 = vld [vmem:[%s3847_s1 + $0x88] sm:$0xff]  ;;  %v180_v50 = vld [vmem:[%s3847_s1 + $0x98] sm:$0xff]  ;;  %v181_v51 = vld [vmem:[%s3847_s1 + $0xa0] sm:$0xff] }
   0xd   :  { %v182_v52 = vld [vmem:[%s3847_s1 + $0xa8] sm:$0xff]  ;;  %v2844_v53 = vpack.c.bf16 %v181_v51, %v180_v50  ;;  %v183_v54 = vld [vmem:[%s3847_s1 + $0xb0] sm:$0xff]  ;;  %v270_v56 = vld [vmem:[%s3847_s1 + $0xb8] sm:$0xff] }
   0xe   :  { %2823 = vmatpush3.bf16.msra.mxu0 %v2820_v11  ;;  %v2848_v55 = vpack.c.bf16 %v183_v54, %v182_v52  ;;  %v271_v57 = vld [vmem:[%s3847_s1 + $0xc0] sm:$0xff]  ;;  %v2260_v2 = vld [vmem:[%s3847_s1 + $0x198] ss:$0 sm:$0xff]  ;;  %v2261_v4 = vld [vmem:[%s3847_s1 + $0x199] ss:$0 sm:$0xff] }
   0xf   :  { %2825 = vmatprep.subr.bf16.mxu0 %v2824_v14  ;;  %2845 = vmatprep.subr.bf16.mxu1 %v2844_v53  ;;  %v2852_v58 = vpack.c.bf16 %v271_v57, %v270_v56  ;;  %v272_v9 = vld [vmem:[%s3847_s1 + $0xc8] sm:$0xff]  ;;  %v273_v10 = vld [vmem:[%s3847_s1 + $0xd0] sm:$0xff]  ;;  %v355_v15 = vld [vmem:[%s3847_s1 + $0xe0] sm:$0xff] }
  0x10   :  { %2847 = vmatpush3.bf16.msra.mxu1 %v2844_v53  ;;  %v2856_v13 = vpack.c.bf16 %v273_v10, %v272_v9  ;;  %v357_v18 = vld [vmem:[%s3847_s1 + $0xf0] sm:$0xff]  ;;  %v2265_v25 = vld [vmem:[%s3847_s1 + $0x19d] ss:$0 sm:$0xff] }
  0x11   :  { %2849 = vmatprep.subr.bf16.mxu1 %v2848_v55 }
  0x12   :  { %2827 = vmatpush3.bf16.msra.mxu0 %v2824_v14  ;;  %v354_v14 = vld [vmem:[%s3847_s1 + $0xd8] sm:$0xff] }
  0x13   :  { %2829 = vmatprep.subr.bf16.mxu0 %v2828_v17  ;;  %v2860_v16 = vpack.c.bf16 %v355_v15, %v354_v14 }
  0x14   :  { %2851 = vmatpush3.bf16.msra.mxu1 %v2848_v55 }
  0x15   :  { %2853 = vmatprep.subr.bf16.mxu1 %v2852_v58 }
  0x16   :  { %2831 = vmatpush3.bf16.msra.mxu0 %v2828_v17  ;;  %v356_v17 = vld [vmem:[%s3847_s1 + $0xe8] sm:$0xff] }
  0x17   :  { %2833 = vmatprep.subr.bf16.mxu0 %v2832_v20  ;;  %v2864_v19 = vpack.c.bf16 %v357_v18, %v356_v17 }
  0x1a   :  { %2835 = vmatpush3.bf16.msra.mxu0 %v2832_v20  ;;  %v2262_v20 = vld [vmem:[%s3847_s1 + $0x19c] ss:$0 sm:$0xff] }
  0x1b   :  { %2837 = vmatprep.subr.bf16.mxu0 %v2836_v23 }
  0x1e   :  { %2839 = vmatpush3.bf16.msra.mxu0 %v2836_v23 }
  0x1f   :  { %2841 = vmatprep.subr.bf16.mxu0 %v2840_v26 }
  0x22   :  { %2843 = vmatpush3.bf16.msra.mxu0 %v2840_v26 }
  0x81   :  { %v21_v29 = vpop.permute.xlu0 %20 }
  0x82   :  { %vm25_vm0 = vcmp.eq.s32.totalorder %v18_v28, %v21_v29 }
  0x83   :  { %2520 = vmatprep.mubr.msk.f32.mxu0 %vm25_vm0, %v3155_v30 }
  0x85   :  { %v24_v31 = vpop.permute.xlu0 %23 }
  0x86   :  { %vm26_vm1 = vcmp.eq.s32.totalorder %v18_v28, %v24_v31  ;;  %v3317_v31 = vld [vmem:[%s3848_s2 + $0xa8] sm:$0xff] }
  0x87   :  { %2521 = vmatmul.mubr.msk.f32.vlgmr.msra.gmra.mrb[0].mxu0 %vm26_vm1, %v3155_v30  ;;  %v2268_v30 = vld [vmem:[%s3847_s1 + $0x19e] ss:$0 sm:$0xff] }
 0x15a   :  { %v2522_v33 = vpop.f32.mrb[0].mxu0 }
 0x15b   :  { %v115_v35 = vpop.f32.mrb[1].mxu0  ;;  %v3244_v37 = vadd.f32 %v2522_v33, %v48_v34  ;;  %v3327_v34 = vld [vmem:[%s3848_s2 + $0xa0] sm:$0xff] }
 0x15c   :  { %v3242_v36 = vadd.f32 %v115_v35, %v47_v32  ;;  %v3322_v32 = vld [vmem:[%s3848_s2 + $0xb8] sm:$0xff]  ;;  %v3332_v35 = vld [vmem:[%s3848_s2 + $0xc8] sm:$0xff] }
 0x15d   :  { %v144_v39 = vsel %vm140_vm2, %v3244_v37, 0.0 }
 0x15e   :  { %v141_v38 = vsel %vm140_vm2, %v3242_v36, 0.0 }
 0x15f   :  { %142 = vadd.xlane.f32.xlu1 %v141_v38  ;;  %v3337_v38 = vld [vmem:[%s3848_s2 + $0xd8] sm:$0xff] }
 0x163   :  { %145 = vadd.xlane.f32.xlu1 %v144_v39 }
 0x1ec   :  { %v143_v40 = vpop.xlane.xlu1 %142 }
 0x1ed   :  { %v148_v41 = vmul.f32 0.03125, %v143_v40 }
 0x1ef   :  { %v150_v42 = vsub.f32 %v3242_v36, %v148_v41  ;;  %v3342_v41 = vld [vmem:[%s3848_s2 + $0xb0] sm:$0xff] }
 0x1f0   :  { %v146_v43 = vpop.xlane.xlu1 %145 }
 0x1f1   :  { %v149_v44 = vmul.f32 0.03125, %v146_v43  ;;  %v152_v45 = vmul.f32 %v150_v42, %v150_v42  ;;  %v3352_v43 = vld [vmem:[%s3848_s2 + $0xd0] sm:$0xff] }
 0x1f3   :  { %v151_v46 = vsub.f32 %v3244_v37, %v149_v44  ;;  %v154_v47 = vsel %vm140_vm2, %v152_v45, 0.0 }
 0x1f4   :  { %155 = vadd.xlane.f32.xlu0 %v154_v47 }
 0x1f5   :  { %v153_v48 = vmul.f32 %v151_v46, %v151_v46 }
 0x1f7   :  { %v157_v49 = vsel %vm140_vm2, %v153_v48, 0.0 }
 0x1f8   :  { %158 = vadd.xlane.f32.xlu1 %v157_v49 }
 0x281   :  { %v156_v59 = vpop.xlane.xlu0 %155 }
 0x282   :  { %v160_v60 = vmul.f32 0.03125, %v156_v59 }
 0x284   :  { %v162_v61 = vadd.f32 1e-05, %v160_v60 }
 0x285   :  { %v159_v62 = vpop.xlane.xlu1 %158 }
 0x286   :  { %3086 = vrsqrt.f32 %v162_v61  ;;  %v161_v63 = vmul.f32 0.03125, %v159_v62 }
 0x288   :  { %v163_v0 = vadd.f32 1e-05, %v161_v63 }
 0x28a   :  { %3088 = vrsqrt.f32 %v163_v0 }
 0x290   :  { %v3087_v1 = vpop.eup %3086 }
 0x291   :  { %v166_v3 = vmul.f32 %v3087_v1, %v150_v42  ;;  %v3347_v42 = vld [vmem:[%s3848_s2 + $0xc0] sm:$0xff] }
 0x293   :  { %v172_v5 = vmul.f32 %v2260_v2, %v166_v3 }
 0x294   :  { %v3089_v6 = vpop.eup %3088 }
 0x295   :  { %v167_v7 = vmul.f32 %v3089_v6, %v151_v46  ;;  %v178_v8 = vadd.f32 %v2261_v4, %v172_v5  ;;  %v3388_v5 = vld [vmem:[%s3848_s2 + $0x80] sm:$0xff] }
 0x297   :  { %v173_v11 = vmul.f32 %v2260_v2, %v167_v7  ;;  %2531 = vmatprep.mubr.msk.f32.mxu1 %vm140_vm2, %v178_v8  ;;  %v3394_v7 = vld [vmem:[%s3848_s2 + $0x88] sm:$0xff] }
 0x299   :  { %v179_v12 = vadd.f32 %v2261_v4, %v173_v11 }
 0x29b   :  { %2532 = vmatmul.mubr.msk.f32.vlgmr.msra.gmra.mrb[0].mxu1 %vm140_vm2, %v179_v12 }
 0x29c   :  { %2855 = vmatpush3.bf16.msra.mxu1 %v2852_v58  ;;  %2542 = vmatprep.mubr.msk.f32.mxu1 %vm140_vm2, %v178_v8 }
 0x29d   :  { %2857 = vmatprep.subr.bf16.mxu1 %v2856_v13 }
 0x2a0   :  { %2859 = vmatpush3.bf16.msra.mxu1 %v2856_v13 }
 0x2a1   :  { %2861 = vmatprep.subr.bf16.mxu1 %v2860_v16 }
 0x2a3   :  { %2543 = vmatmul.mubr.msk.f32.vlgmr.msra.gmra.mrb[2].mxu1 %vm140_vm2, %v179_v12 }
 0x2a4   :  { %2863 = vmatpush3.bf16.msra.mxu1 %v2860_v16  ;;  %2553 = vmatprep.mubr.msk.f32.mxu1 %vm140_vm2, %v178_v8 }
 0x2a5   :  { %2865 = vmatprep.subr.bf16.mxu1 %v2864_v19 }
 0x2a8   :  { %2867 = vmatpush3.bf16.msra.mxu1 %v2864_v19 }
 0x2ab   :  { %2554 = vmatmul.mubr.msk.f32.vlgmr.msra.gmra.mrb[4].mxu1 %vm140_vm2, %v179_v12 }
 0x36e   :  { %v2533_v21 = vpop.f32.mrb[0].mxu1 }
 0x36f   :  { %v3305_v22 = vadd.f32 %v2533_v21, %v2262_v20  ;;  %v261_v23 = vpop.f32.mrb[1].mxu1  ;;  %v3405_v21 = vld [vmem:[%s3848_s2 + $0x90] sm:$0xff] }
 0x370   :  { %v262_v24 = vadd.f32 %v2262_v20, %v261_v23 }
 0x372   :  { %2564 = vmatprep.mubr.msk.f32.mxu1 %vm140_vm2, %v262_v24 }
 0x376   :  { %v2544_v26 = vpop.f32.mrb[2].mxu1 }
 0x377   :  { %v345_v27 = vpop.f32.mrb[3].mxu1  ;;  %v351_v29 = vadd.f32 %v2544_v26, %v2265_v25 }
 0x378   :  { %v346_v28 = vadd.f32 %v2265_v25, %v345_v27  ;;  %v3412_v25 = vld [vmem:[%s3848_s2 + $0x98] sm:$0xff] }
 0x37a   :  { %438 = vxpose.xlu1.b32.start [1/2] (short) (narrow) %v346_v28, 32 }
 0x37e   :  { %v2555_v33 = vpop.f32.mrb[4].mxu1  ;;  %439 = vxpose.xlu1.b32.end [2/2] (short) (narrow) %v351_v29, 32 }
 0x37f   :  { %v435_v39 = vadd.f32 %v2555_v33, %v2268_v30  ;;  %v429_v40 = vpop.f32.mrb[5].mxu1 }
 0x380   :  { %v430_v44 = vadd.f32 %v2268_v30, %v429_v40 }
 0x381   :  { %v623_v45 = vmul.f32 %v435_v39, %v3317_v31  ;;  %v625_v46 = vmul.f32 %v435_v39, %v3322_v32  ;;  %v627_v47 = vmul.f32 %v435_v39, %v3332_v35  ;;  %v629_v48 = vmul.f32 %v435_v39, %v3337_v38  ;;  %v3431_v39 = vld [vmem:[%s3848_s2 + $0x78] sm:$0xff] }
 0x382   :  { %v622_v49 = vmul.f32 %v430_v44, %v3327_v34  ;;  %v624_v50 = vmul.f32 %v430_v44, %v3342_v41  ;;  %v626_v51 = vmul.f32 %v430_v44, %v3347_v42  ;;  %v628_v52 = vmul.f32 %v430_v44, %v3352_v43 }
 0x384   :  { %v3362_v53 = vpack.c.bf16 %v623_v45, %v622_v49  ;;  %v3364_v54 = vpack.c.bf16 %v625_v46, %v624_v50  ;;  %v3366_v55 = vpack.c.bf16 %v627_v47, %v626_v51  ;;  %v3368_v56 = vpack.c.bf16 %v629_v48, %v628_v52 }
 0x385   :  { %v3444_v49 = vpack.c.bf16 %v3317_v31, %v3327_v34 }
 0x3fa   :  { %v454_v57 = vpop.trf.xlu1 }
 0x3fb   :  { %474 = vrot.lane.b32.xlu0 %v454_v57, %s3156_s18 }
 0x3fe   :  { %v455_v58 = vpop.trf.xlu1 }
 0x3ff   :  { %486 = vrot.lane.b32.xlu0 %v454_v57, %s3157_s19  ;;  %488 = vrot.lane.b32.xlu1 %v455_v58, %s3157_s19 }
 0x402   :  { %v456_v59 = vpop.trf.xlu1 }
 0x403   :  { %476 = vrot.lane.b32.xlu0 %v455_v58, %s3156_s18 }
 0x406   :  { %v457_v60 = vpop.trf.xlu1 }
 0x407   :  { %498 = vrot.lane.b32.xlu0 %v454_v57, %s3158_s20 }
 0x40b   :  { %500 = vrot.lane.b32.xlu0 %v455_v58, %s3158_s20 }
 0x40f   :  { %478 = vrot.lane.b32.xlu0 %v456_v59, %s3156_s18 }
 0x413   :  { %490 = vrot.lane.b32.xlu0 %v456_v59, %s3157_s19 }
 0x417   :  { %502 = vrot.lane.b32.xlu0 %v456_v59, %s3158_s20 }
 0x41b   :  { %480 = vrot.lane.b32.xlu0 %v457_v60, %s3156_s18 }
 0x41f   :  { %492 = vrot.lane.b32.xlu0 %v457_v60, %s3157_s19 }
 0x423   :  { %504 = vrot.lane.b32.xlu0 %v457_v60, %s3158_s20 }
 0x46d   :  { %v475_v61 = vpop.permute.xlu0 %474 }
 0x46e   :  { %v511_v1 = vsel %vm510_vm3, %v454_v57, %v475_v61  ;;  %v3449_v57 = vpack.c.bf16 %v3322_v32, %v3342_v41  ;;  %v790_v61 = vld [vmem:[%s3847_s1 + $0xf8] sm:$0xff] }
 0x471   :  { %v487_v62 = vpop.permute.xlu0 %486  ;;  %v489_v3 = vpop.permute.xlu1 %488 }
 0x472   :  { %v515_v4 = vsel %vm140_vm2, %v511_v1, %v487_v62  ;;  %v791_v62 = vld [vmem:[%s3847_s1 + $0x100] sm:$0xff]  ;;  %v793_v1 = vld [vmem:[%s3847_s1 + $0x110] sm:$0xff] }
 0x475   :  { %v477_v63 = vpop.permute.xlu0 %476 }
 0x476   :  { %v512_v2 = vsel %vm510_vm3, %v455_v58, %v477_v63  ;;  %v2908_v63 = vpack.c.bf16 %v791_v62, %v790_v61 }
 0x477   :  { %v516_v8 = vsel %vm140_vm2, %v512_v2, %v489_v3 }
 0x478   :  { %2909 = vmatprep.subr.bf16.mxu0 %v2908_v63 }
 0x479   :  { %v499_v0 = vpop.permute.xlu0 %498  ;;  %2911 = vmatpush3.bf16.msra.mxu0 %v2908_v63 }
 0x47a   :  { %v520_v6 = vsel %vm519_vm4, %v515_v4, %v499_v0  ;;  %v792_v0 = vld [vmem:[%s3847_s1 + $0x108] sm:$0xff] }
 0x47b   :  { %v524_v11 = vmul.f32 %v520_v6, %v3388_v5  ;;  %v2912_v2 = vpack.c.bf16 %v793_v1, %v792_v0  ;;  %v2280_v0 = vld [vmem:[%s3847_s1 + $0x19a] ss:$0 sm:$0xff] }
 0x47d   :  { %v501_v9 = vpop.permute.xlu0 %500  ;;  %2913 = vmatprep.subr.bf16.mxu0 %v2912_v2 }
 0x47e   :  { %v521_v10 = vsel %vm519_vm4, %v516_v8, %v501_v9  ;;  %2915 = vmatpush3.bf16.msra.mxu0 %v2912_v2  ;;  %v2281_v2 = vld [vmem:[%s3847_s1 + $0x19b] ss:$0 sm:$0xff] }
 0x47f   :  { %v525_v12 = vmul.f32 %v521_v10, %v3394_v7 }
 0x481   :  { %v479_v13 = vpop.permute.xlu0 %478  ;;  %v2868_v14 = vpack.c.bf16 %v525_v12, %v524_v11 }
 0x482   :  { %v513_v19 = vsel %vm510_vm3, %v456_v59, %v479_v13  ;;  %v3458_v59 = vpack.c.bf16 %v3332_v35, %v3347_v42  ;;  %v2277_v13 = vld [vmem:[%s3847_s1 + $0x19f] ss:$0 sm:$0xff] }
 0x483   :  { %2869 = vmatprep.subr.bf16.mxu1 %v2868_v14 }
 0x484   :  { %2871 = vmatpush3.bf16.msra.mxu1 %v2868_v14 }
 0x485   :  { %v491_v15 = vpop.permute.xlu0 %490 }
 0x486   :  { %v517_v20 = vsel %vm140_vm2, %v513_v19, %v491_v15 }
 0x489   :  { %v503_v16 = vpop.permute.xlu0 %502 }
 0x48a   :  { %v522_v23 = vsel %vm519_vm4, %v517_v20, %v503_v16 }
 0x48b   :  { %v526_v29 = vmul.f32 %v522_v23, %v3405_v21 }
 0x48d   :  { %v481_v17 = vpop.permute.xlu0 %480 }
 0x48e   :  { %v514_v24 = vsel %vm510_vm3, %v457_v60, %v481_v17  ;;  %v3464_v60 = vpack.c.bf16 %v3337_v38, %v3352_v43 }
 0x491   :  { %v493_v18 = vpop.permute.xlu0 %492 }
 0x492   :  { %v518_v26 = vsel %vm140_vm2, %v514_v24, %v493_v18 }
 0x495   :  { %v505_v27 = vpop.permute.xlu0 %504 }
 0x496   :  { %v523_v28 = vsel %vm519_vm4, %v518_v26, %v505_v27 }
 0x497   :  { %v527_v30 = vmul.f32 %v523_v28, %v3412_v25 }
 0x499   :  { %v2872_v33 = vpack.c.bf16 %v527_v30, %v526_v29 }
 0x49b   :  { %2873 = vmatprep.subr.bf16.mxu1 %v2872_v33 }
 0x49c   :  { %2875 = vmatpush3.bf16.msra.mxu1 %v2872_v33 }
 0x49d   :  { %2877 = vmatprep.subr.bf16.mxu1 %v3362_v53 }
 0x49f   :  { %2565 = vmatmul.mubr.msk.f32.vlgmr.msra.gmra.mrb[6].mxu1 %vm140_vm2, %v3305_v22  ;;  %v3436_v22 = vld [vmem:[%s3848_s2 + $0x70] sm:$0xff] }
 0x4a0   :  { %2879 = vmatpush3.bf16.msra.mxu1 %v3362_v53 }
 0x4a1   :  { %2881 = vmatprep.subr.bf16.mxu1 %v3364_v54 }
 0x4a4   :  { %2883 = vmatpush3.bf16.msra.mxu1 %v3364_v54 }
 0x4a5   :  { %2885 = vmatprep.subr.bf16.mxu1 %v3366_v55 }
 0x4a8   :  { %2887 = vmatpush3.bf16.msra.mxu1 %v3366_v55 }
 0x4a9   :  { %2889 = vmatprep.subr.bf16.mxu1 %v3368_v56 }
 0x4ac   :  { %2891 = vmatpush3.bf16.msra.mxu1 %v3368_v56 }
 0x4ad   :  { %2893 = vmatprep.subr.bf16.mxu1 %v3444_v49 }
 0x572   :  { %v2566_v40 = vpop.f32.mrb[6].mxu1 }
 0x573   :  { %v606_v44 = vadd.f32 %v2566_v40, %v3431_v39  ;;  %v600_v45 = vpop.f32.mrb[7].mxu1 }
 0x574   :  { %v601_v46 = vadd.f32 %v600_v45, %v3436_v22  ;;  %v923_v45 = vld [vmem:[%s3848_s2 + $0x8] sm:$0xff] }
 0x575   :  { %v613_v47 = vsel %vm609_vm5, %v606_v44, -inf }
 0x576   :  { %614 = vmax.xlane.f32.xlu1 %v613_v47  ;;  %v610_v48 = vsel %vm609_vm5, %v601_v46, -inf  ;;  %v924_v47 = vld [vmem:[%s3848_s2 + $0x10] sm:$0xff] }
 0x577   :  { %611 = vmax.xlane.f32.xlu0 %v610_v48  ;;  %v925_v48 = vld [vmem:[%s3848_s2 + $0x18] sm:$0xff] }
 0x603   :  { %v615_v50 = vpop.xlane.xlu1 %614 }
 0x604   :  { %v617_v51 = vsub.f32 %v606_v44, %v615_v50  ;;  %v612_v52 = vpop.xlane.xlu0 %611  ;;  %v922_v44 = vld [vmem:[%s3848_s2] sm:$0xff]  ;;  %v2920_v50 = vpack.c.bf16 %v925_v48, %v924_v47 }
 0x605   :  { %v616_v53 = vsub.f32 %v601_v46, %v612_v52  ;;  %v2916_v46 = vpack.c.bf16 %v923_v45, %v922_v44  ;;  %v1031_v52 = vld [vmem:[%s3847_s1 + $0x120] sm:$0xff]  ;;  %v1045_v44 = vld [vmem:[%s3847_s1 + $0x190] sm:$0xff] }
 0x606   :  { %v620_v54 = vmul.f32 1.442695, %v617_v51  ;;  %v1030_v51 = vld [vmem:[%s3847_s1 + $0x118] sm:$0xff] }
 0x607   :  { %v618_v55 = vmul.f32 1.442695, %v616_v53  ;;  %v2924_v53 = vpack.c.bf16 %v1031_v52, %v1030_v51 }
 0x609   :  { %3090 = vpow2.f32 %v618_v55  ;;  %2925 = vmatprep.subr.bf16.mxu0 %v2924_v53 }
 0x60a   :  { %3092 = vpow2.f32 %v620_v54 }
 0x613   :  { %v3091_v56 = vpop.eup %3090 }
 0x614   :  { %v3093_v58 = vpop.eup %3092  ;;  %2583 = vmatprep.mubr.msk.f32.mxu1 %vm609_vm5, %v3091_v56 }
 0x615   :  { %2584 = vmatmul.mubr.msk.f32.vlgmr.msra.gmra.mrb[8].mxu1 %vm609_vm5, %v3093_v58 }
 0x616   :  { %2895 = vmatpush3.bf16.msra.mxu1 %v3444_v49  ;;  %2602 = vmatprep.mubr.msk.f32.mxu1 %vm609_vm5, %v3091_v56 }
 0x617   :  { %2897 = vmatprep.subr.bf16.mxu1 %v3449_v57 }
 0x61a   :  { %2899 = vmatpush3.bf16.msra.mxu1 %v3449_v57 }
 0x61b   :  { %2901 = vmatprep.subr.bf16.mxu1 %v3458_v59 }
 0x61e   :  { %2903 = vmatpush3.bf16.msra.mxu1 %v3458_v59 }
 0x61f   :  { %2905 = vmatprep.subr.bf16.mxu1 %v3464_v60 }
 0x622   :  { %2907 = vmatpush3.bf16.msra.mxu1 %v3464_v60 }
 0x623   :  { %2917 = vmatprep.subr.bf16.mxu1 %v2916_v46 }
 0x625   :  { %2603 = vmatmul.mubr.msk.f32.vlgmr.msra.gmra.mrb[10].mxu1 %vm609_vm5, %v3093_v58 }
 0x626   :  { %2919 = vmatpush3.bf16.msra.mxu1 %v2916_v46  ;;  %v2282_v46 = vld [vmem:[%s3848_s2 + $0x20] ss:$0 sm:$0xff] }
 0x627   :  { %2921 = vmatprep.subr.bf16.mxu1 %v2920_v50 }
 0x62a   :  { %2923 = vmatpush3.bf16.msra.mxu1 %v2920_v50 }
 0x6e8   :  { %v2585_v3 = vpop.f32.mrb[8].mxu1 }
 0x6e9   :  { %v702_v4 = vpop.f32.mrb[9].mxu1 }
 0x6f8   :  { %v2604_v6 = vpop.f32.mrb[10].mxu1 }
 0x6f9   :  { %3094 = vrcp.f32 %v2604_v6  ;;  %v777_v8 = vpop.f32.mrb[11].mxu1 }
 0x6fa   :  { %3096 = vrcp.f32 %v777_v8 }
 0x703   :  { %v3095_v9 = vpop.eup %3094 }
 0x704   :  { %v3097_v10 = vpop.eup %3096  ;;  %v789_v11 = vmul.f32 %v3095_v9, %v2585_v3 }
 0x705   :  { %v788_v12 = vmul.f32 %v3097_v10, %v702_v4 }
 0x707   :  { %2613 = vmatprep.mubr.msk.f32.mxu0 %vm140_vm2, %v788_v12  ;;  %v1033_v12 = vld [vmem:[%s3847_s1 + $0x130] sm:$0xff] }
 0x708   :  { %2614 = vmatmul.mubr.msk.f32.vlgmr.msra.gmra.mrb[2].mxu0 %vm140_vm2, %v789_v11  ;;  %v1032_v11 = vld [vmem:[%s3847_s1 + $0x128] sm:$0xff] }
 0x709   :  { %2927 = vmatpush3.bf16.msra.mxu0 %v2924_v53 }
 0x7db   :  { %v2615_v14 = vpop.f32.mrb[2].mxu0 }
 0x7dc   :  { %v871_v15 = vpop.f32.mrb[3].mxu0  ;;  %v877_v16 = vadd.f32 %v2615_v14, %v2277_v13  ;;  %v1034_v14 = vld [vmem:[%s3847_s1 + $0x138] sm:$0xff] }
 0x7dd   :  { %v872_v17 = vadd.f32 %v2277_v13, %v871_v15  ;;  %v2928_v13 = vpack.c.bf16 %v1033_v12, %v1032_v11  ;;  %v1035_v15 = vld [vmem:[%s3847_s1 + $0x140] sm:$0xff] }
 0x7de   :  { %v3491_v19 = vadd.f32 %v877_v16, %v3244_v37  ;;  %v2932_v16 = vpack.c.bf16 %v1035_v15, %v1034_v14  ;;  %v2285_v11 = vld [vmem:[%s3847_s1 + $0x1a0] ss:$0 sm:$0xff] }
 0x7df   :  { %v3488_v18 = vadd.f32 %v872_v17, %v3242_v36  ;;  %2929 = vmatprep.subr.bf16.mxu0 %v2928_v13  ;;  %v1036_v17 = vld [vmem:[%s3847_s1 + $0x148] sm:$0xff] }
 0x7e0   :  { %v887_v23 = vsel %vm140_vm2, %v3491_v19, 0.0  ;;  %2931 = vmatpush3.bf16.msra.mxu0 %v2928_v13 }
 0x7e1   :  { %v884_v20 = vsel %vm140_vm2, %v3488_v18, 0.0  ;;  %2933 = vmatprep.subr.bf16.mxu0 %v2932_v16 }
 0x7e2   :  { %885 = vadd.xlane.f32.xlu0 %v884_v20  ;;  %v1037_v20 = vld [vmem:[%s3847_s1 + $0x150] sm:$0xff] }
 0x7e4   :  { %2935 = vmatpush3.bf16.msra.mxu0 %v2932_v16 }
 0x7e6   :  { %888 = vadd.xlane.f32.xlu0 %v887_v23  ;;  %v2936_v23 = vpack.c.bf16 %v1037_v20, %v1036_v17 }
 0x7e8   :  { %2937 = vmatprep.subr.bf16.mxu0 %v2936_v23 }
 0x7e9   :  { %2939 = vmatpush3.bf16.msra.mxu0 %v2936_v23 }
 0x86f   :  { %v886_v24 = vpop.xlane.xlu0 %885 }
 0x870   :  { %v890_v26 = vmul.f32 0.03125, %v886_v24  ;;  %v1038_v24 = vld [vmem:[%s3847_s1 + $0x158] sm:$0xff] }
 0x872   :  { %v892_v27 = vsub.f32 %v3488_v18, %v890_v26  ;;  %v1039_v26 = vld [vmem:[%s3847_s1 + $0x160] sm:$0xff] }
 0x873   :  { %v889_v28 = vpop.xlane.xlu0 %888 }
 0x874   :  { %v891_v29 = vmul.f32 0.03125, %v889_v28  ;;  %v894_v30 = vmul.f32 %v892_v27, %v892_v27  ;;  %v2940_v28 = vpack.c.bf16 %v1039_v26, %v1038_v24 }
 0x876   :  { %v893_v36 = vsub.f32 %v3491_v19, %v891_v29  ;;  %v896_v37 = vsel %vm140_vm2, %v894_v30, 0.0  ;;  %v1041_v29 = vld [vmem:[%s3847_s1 + $0x170] sm:$0xff]  ;;  %2941 = vmatprep.subr.bf16.mxu0 %v2940_v28 }
 0x877   :  { %897 = vadd.xlane.f32.xlu0 %v896_v37  ;;  %v1043_v37 = vld [vmem:[%s3847_s1 + $0x180] sm:$0xff]  ;;  %2943 = vmatpush3.bf16.msra.mxu0 %v2940_v28 }
 0x878   :  { %v895_v33 = vmul.f32 %v893_v36, %v893_v36 }
 0x87a   :  { %v899_v40 = vsel %vm140_vm2, %v895_v33, 0.0 }
 0x87b   :  { %900 = vadd.xlane.f32.xlu1 %v899_v40  ;;  %v1044_v40 = vld [vmem:[%s3847_s1 + $0x188] sm:$0xff] }
 0x87c   :  { %v2952_v45 = vpack.c.bf16 %v1045_v44, %v1044_v40  ;;  %v1169_v40 = vld [vmem:[%s3847_s1 + $0x1b0] sm:$0xff] }
 0x904   :  { %v898_v54 = vpop.xlane.xlu0 %897 }
 0x905   :  { %v902_v55 = vmul.f32 0.03125, %v898_v54 }
 0x907   :  { %v904_v56 = vadd.f32 1e-05, %v902_v55 }
 0x908   :  { %v901_v58 = vpop.xlane.xlu1 %900 }
 0x909   :  { %3098 = vrsqrt.f32 %v904_v56  ;;  %v903_v61 = vmul.f32 0.03125, %v901_v58 }
 0x90b   :  { %v905_v62 = vadd.f32 1e-05, %v903_v61 }
 0x90d   :  { %3100 = vrsqrt.f32 %v905_v62 }
 0x913   :  { %v3099_v63 = vpop.eup %3098 }
 0x914   :  { %v908_v1 = vmul.f32 %v3099_v63, %v892_v27  ;;  %v1040_v27 = vld [vmem:[%s3847_s1 + $0x168] sm:$0xff] }
 0x915   :  { %v2944_v30 = vpack.c.bf16 %v1041_v29, %v1040_v27 }
 0x916   :  { %v914_v3 = vmul.f32 %v2280_v0, %v908_v1 }
 0x917   :  { %v3101_v4 = vpop.eup %3100  ;;  %2945 = vmatprep.subr.bf16.mxu0 %v2944_v30 }
 0x918   :  { %v909_v6 = vmul.f32 %v3101_v4, %v893_v36  ;;  %v920_v8 = vadd.f32 %v2281_v2, %v914_v3  ;;  %v1042_v36 = vld [vmem:[%s3847_s1 + $0x178] sm:$0xff]  ;;  %2947 = vmatpush3.bf16.msra.mxu0 %v2944_v30 }
 0x919   :  { %v2948_v33 = vpack.c.bf16 %v1043_v37, %v1042_v36 }
 0x91a   :  { %v915_v9 = vmul.f32 %v2280_v0, %v909_v6  ;;  %2624 = vmatprep.mubr.msk.f32.mxu1 %vm140_vm2, %v920_v8 }
 0x91b   :  { %2949 = vmatprep.subr.bf16.mxu0 %v2948_v33 }
 0x91c   :  { %v921_v10 = vadd.f32 %v2281_v2, %v915_v9  ;;  %2951 = vmatpush3.bf16.msra.mxu0 %v2948_v33  ;;  %v1168_v33 = vld [vmem:[%s3847_s1 + $0x1a8] sm:$0xff] }
 0x91d   :  { %2953 = vmatprep.subr.bf16.mxu0 %v2952_v45  ;;  %v2956_v44 = vpack.c.bf16 %v1169_v40, %v1168_v33  ;;  %v2294_v33 = vld [vmem:[%s3847_s1 + $0x2ae] ss:$0 sm:$0xff] }
 0x91e   :  { %2625 = vmatmul.mubr.msk.f32.vlgmr.msra.gmra.mrb[12].mxu1 %vm140_vm2, %v921_v10 }
 0x91f   :  { %2957 = vmatprep.subr.bf16.mxu1 %v2956_v44 }
 0x920   :  { %2955 = vmatpush3.bf16.msra.mxu0 %v2952_v45  ;;  %2959 = vmatpush3.bf16.msra.mxu1 %v2956_v44  ;;  %v1170_v45 = vld [vmem:[%s3847_s1 + $0x1b8] sm:$0xff] }
 0x9f1   :  { %v2626_v47 = vpop.f32.mrb[12].mxu1 }
 0x9f2   :  { %v1009_v48 = vadd.f32 %v2626_v47, %v2282_v46  ;;  %v1003_v50 = vpop.f32.mrb[13].mxu1 }
 0x9f3   :  { %v1004_v51 = vadd.f32 %v2282_v46, %v1003_v50  ;;  %v1171_v46 = vld [vmem:[%s3847_s1 + $0x1c0] sm:$0xff]  ;;  %v1259_v50 = vld [vmem:[%s3847_s1 + $0x1d0] sm:$0xff] }
 0x9f4   :  { %v1015_v52 = vmul.f32 0.044715, %v1009_v48  ;;  %v1013_v8 = vmul.f32 0.5, %v1009_v48  ;;  %v2960_v47 = vpack.c.bf16 %v1171_v46, %v1170_v45 }
 0x9f5   :  { %v1014_v53 = vmul.f32 0.044715, %v1004_v51  ;;  %v1012_v4 = vmul.f32 0.5, %v1004_v51 }
 0x9f6   :  { %v1017_v54 = vmul.f32 %v1015_v52, %v1009_v48  ;;  %2961 = vmatprep.subr.bf16.mxu1 %v2960_v47 }
 0x9f7   :  { %v1016_v55 = vmul.f32 %v1014_v53, %v1004_v51  ;;  %2963 = vmatpush3.bf16.msra.mxu1 %v2960_v47 }
 0x9f8   :  { %v1019_v56 = vmul.f32 %v1017_v54, %v1009_v48 }
 0x9f9   :  { %v1018_v58 = vmul.f32 %v1016_v55, %v1004_v51 }
 0x9fa   :  { %v1021_v61 = vadd.f32 %v1019_v56, %v1009_v48  ;;  %v1258_v48 = vld [vmem:[%s3847_s1 + $0x1c8] sm:$0xff] }
 0x9fb   :  { %v1020_v62 = vadd.f32 %v1018_v58, %v1004_v51  ;;  %v2964_v51 = vpack.c.bf16 %v1259_v50, %v1258_v48 }
 0x9fc   :  { %v1023_v63 = vmul.f32 0.7978846, %v1021_v61 }
 0x9fd   :  { %v1022_v0 = vmul.f32 0.7978846, %v1020_v62  ;;  %2965 = vmatprep.subr.bf16.mxu1 %v2964_v51  ;;  %v2286_v62 = vld [vmem:[%s3847_s1 + $0x2a8] ss:$0 sm:$0xff] }
 0x9fe   :  { %3102 = vtanh.f32 %v1023_v63 }
 0x9ff   :  { %3104 = vtanh.f32 %v1022_v0 }
 0xa08   :  { %v3103_v1 = vpop.eup %3102 }
 0xa09   :  { %v3105_v2 = vpop.eup %3104  ;;  %v1027_v3 = vadd.f32 1.0, %v3103_v1 }
 0xa0a   :  { %v1026_v6 = vadd.f32 1.0, %v3105_v2  ;;  %v2287_v2 = vld [vmem:[%s3847_s1 + $0x2a9] ss:$0 sm:$0xff] }
 0xa0b   :  { %v1029_v10 = vmul.f32 %v1027_v3, %v1013_v8  ;;  %v1261_v8 = vld [vmem:[%s3847_s1 + $0x1e0] sm:$0xff] }
 0xa0c   :  { %v1028_v9 = vmul.f32 %v1026_v6, %v1012_v4  ;;  %v1260_v6 = vld [vmem:[%s3847_s1 + $0x1d8] sm:$0xff] }
 0xa0e   :  { %2659 = vmatprep.mubr.f32.mxu0 %v1028_v9 }
 0xa0f   :  { %2660 = vmatmul.mubr.f32.vlgmr.msra.gmra.mrb[4].mxu0 %v1029_v10 }
 0xae2   :  { %v2661_v12 = vpop.f32.mrb[4].mxu0 }
 0xae3   :  { %v1123_v13 = vadd.f32 %v2661_v12, %v2285_v11  ;;  %v1117_v14 = vpop.f32.mrb[5].mxu0  ;;  %v1342_v12 = vld [vmem:[%s3847_s1 + $0x1e8] sm:$0xff] }
 0xae4   :  { %v1118_v15 = vadd.f32 %v2285_v11, %v1117_v14  ;;  %v2968_v11 = vpack.c.bf16 %v1261_v8, %v1260_v6 }
 0xae5   :  { %v3576_v16 = vadd.f32 %v1123_v13, %v3491_v19  ;;  %v1343_v13 = vld [vmem:[%s3847_s1 + $0x1f0] sm:$0xff] }
 0xae6   :  { %v3579_v17 = vadd.f32 %v1118_v15, %v3488_v18  ;;  %v2972_v14 = vpack.c.bf16 %v1343_v13, %v1342_v12  ;;  %v1344_v15 = vld [vmem:[%s3847_s1 + $0x1f8] sm:$0xff] }
 0xae7   :  { %v1133_v20 = vsel %vm140_vm2, %v3576_v16, 0.0 }
 0xae8   :  { %1134 = vadd.xlane.f32.xlu1 %v1133_v20  ;;  %v1130_v23 = vsel %vm140_vm2, %v3579_v17, 0.0  ;;  %v1345_v20 = vld [vmem:[%s3847_s1 + $0x200] sm:$0xff] }
 0xae9   :  { %1131 = vadd.xlane.f32.xlu0 %v1130_v23  ;;  %v2976_v23 = vpack.c.bf16 %v1345_v20, %v1344_v15 }
 0xb75   :  { %v1135_v24 = vpop.xlane.xlu1 %1134 }
 0xb76   :  { %v1137_v26 = vmul.f32 0.03125, %v1135_v24  ;;  %v1132_v27 = vpop.xlane.xlu0 %1131  ;;  %v2288_v24 = vld [vmem:[%s3847_s1 + $0x2ac] ss:$0 sm:$0xff] }
 0xb77   :  { %v1136_v28 = vmul.f32 0.03125, %v1132_v27 }
 0xb78   :  { %v1139_v29 = vsub.f32 %v3576_v16, %v1137_v26 }
 0xb79   :  { %v1138_v19 = vsub.f32 %v3579_v17, %v1136_v28 }
 0xb7a   :  { %v1141_v30 = vmul.f32 %v1139_v29, %v1139_v29 }
 0xb7b   :  { %v1140_v36 = vmul.f32 %v1138_v19, %v1138_v19 }
 0xb7c   :  { %v1145_v18 = vsel %vm140_vm2, %v1141_v30, 0.0 }
 0xb7d   :  { %1146 = vadd.xlane.f32.xlu1 %v1145_v18  ;;  %v1142_v37 = vsel %vm140_vm2, %v1140_v36, 0.0 }
 0xb7e   :  { %1143 = vadd.xlane.f32.xlu0 %v1142_v37 }
 0xc0a   :  { %v1147_v52 = vpop.xlane.xlu1 %1146 }
 0xc0b   :  { %v1149_v53 = vmul.f32 0.03125, %v1147_v52  ;;  %v1144_v54 = vpop.xlane.xlu0 %1143 }
 0xc0c   :  { %v1148_v55 = vmul.f32 0.03125, %v1144_v54 }
 0xc0d   :  { %v1151_v56 = vadd.f32 1e-05, %v1149_v53 }
 0xc0e   :  { %v1150_v58 = vadd.f32 1e-05, %v1148_v55 }
 0xc0f   :  { %3106 = vrsqrt.f32 %v1151_v56 }
 0xc10   :  { %3108 = vrsqrt.f32 %v1150_v58 }
 0xc19   :  { %v3107_v61 = vpop.eup %3106 }
 0xc1a   :  { %v3109_v63 = vpop.eup %3108  ;;  %v1155_v0 = vmul.f32 %v3107_v61, %v1139_v29 }
 0xc1b   :  { %v1154_v1 = vmul.f32 %v3109_v63, %v1138_v19  ;;  %v2291_v19 = vld [vmem:[%s3847_s1 + $0x2ad] ss:$0 sm:$0xff] }
 0xc1c   :  { %v1161_v3 = vmul.f32 %v2286_v62, %v1155_v0 }
 0xc1d   :  { %v1160_v4 = vmul.f32 %v2286_v62, %v1154_v1 }
 0xc1e   :  { %v1167_v10 = vadd.f32 %v2287_v2, %v1161_v3 }
 0xc1f   :  { %v1166_v9 = vadd.f32 %v2287_v2, %v1160_v4 }
 0xc21   :  { %2670 = vmatprep.mubr.msk.f32.mxu1 %vm140_vm2, %v1166_v9 }
 0xc22   :  { %2671 = vmatmul.mubr.msk.f32.vlgmr.msra.gmra.mrb[14].mxu1 %vm140_vm2, %v1167_v10 }
 0xc23   :  { %2967 = vmatpush3.bf16.msra.mxu1 %v2964_v51  ;;  %2681 = vmatprep.mubr.msk.f32.mxu1 %vm140_vm2, %v1166_v9 }
 0xc24   :  { %2969 = vmatprep.subr.bf16.mxu1 %v2968_v11 }
 0xc27   :  { %2971 = vmatpush3.bf16.msra.mxu1 %v2968_v11 }
 0xc28   :  { %2973 = vmatprep.subr.bf16.mxu1 %v2972_v14 }
 0xc2a   :  { %2682 = vmatmul.mubr.msk.f32.vlgmr.msra.gmra.mrb[16].mxu1 %vm140_vm2, %v1167_v10 }
 0xc2b   :  { %2975 = vmatpush3.bf16.msra.mxu1 %v2972_v14  ;;  %2692 = vmatprep.mubr.msk.f32.mxu1 %vm140_vm2, %v1166_v9 }
 0xc2c   :  { %2977 = vmatprep.subr.bf16.mxu1 %v2976_v23 }
 0xc2f   :  { %2979 = vmatpush3.bf16.msra.mxu1 %v2976_v23 }
 0xc32   :  { %2693 = vmatmul.mubr.msk.f32.vlgmr.msra.gmra.mrb[18].mxu1 %vm140_vm2, %v1167_v10 }
 0xcf5   :  { %v2672_v26 = vpop.f32.mrb[14].mxu1 }
 0xcf6   :  { %v3640_v27 = vadd.f32 %v2672_v26, %v2288_v24  ;;  %v1249_v28 = vpop.f32.mrb[15].mxu1 }
 0xcf7   :  { %v1250_v29 = vadd.f32 %v2288_v24, %v1249_v28 }
 0xcf9   :  { %2703 = vmatprep.mubr.msk.f32.mxu1 %vm140_vm2, %v1250_v29 }
 0xcfd   :  { %v2683_v30 = vpop.f32.mrb[16].mxu1 }
 0xcfe   :  { %v1333_v36 = vpop.f32.mrb[17].mxu1  ;;  %v1339_v37 = vadd.f32 %v2683_v30, %v2291_v19 }
 0xcff   :  { %v1334_v18 = vadd.f32 %v2291_v19, %v1333_v36 }
 0xd01   :  { %1426 = vxpose.xlu0.b32.start [1/2] (short) (narrow) %v1334_v18, 32 }
 0xd05   :  { %v2694_v40 = vpop.f32.mrb[18].mxu1  ;;  %1427 = vxpose.xlu0.b32.end [2/2] (short) (narrow) %v1339_v37, 32 }
 0xd06   :  { %v1423_v44 = vadd.f32 %v2694_v40, %v2294_v33  ;;  %v1417_v45 = vpop.f32.mrb[19].mxu1 }
 0xd07   :  { %v1418_v46 = vadd.f32 %v2294_v33, %v1417_v45 }
 0xd08   :  { %v1608_v47 = vmul.f32 %v1423_v44, %v3317_v31  ;;  %v1610_v48 = vmul.f32 %v1423_v44, %v3322_v32  ;;  %v1612_v50 = vmul.f32 %v1423_v44, %v3332_v35  ;;  %v1614_v51 = vmul.f32 %v1423_v44, %v3337_v38 }
 0xd09   :  { %v1607_v52 = vmul.f32 %v1418_v46, %v3327_v34  ;;  %v1609_v53 = vmul.f32 %v1418_v46, %v3342_v41  ;;  %v1611_v54 = vmul.f32 %v1418_v46, %v3347_v42  ;;  %v1613_v55 = vmul.f32 %v1418_v46, %v3352_v43  ;;  %v1776_v46 = vld [vmem:[%s3847_s1 + $0x210] sm:$0xff] }
 0xd0b   :  { %v2988_v56 = vpack.c.bf16 %v1608_v47, %v1607_v52  ;;  %v2992_v58 = vpack.c.bf16 %v1610_v48, %v1609_v53  ;;  %v2996_v61 = vpack.c.bf16 %v1612_v50, %v1611_v54  ;;  %v3000_v62 = vpack.c.bf16 %v1614_v51, %v1613_v55  ;;  %v1777_v48 = vld [vmem:[%s3847_s1 + $0x218] sm:$0xff]  ;;  %v1778_v50 = vld [vmem:[%s3847_s1 + $0x220] sm:$0xff] }
 0xd0c   :  { %v3024_v51 = vpack.c.bf16 %v1778_v50, %v1777_v48  ;;  %v2023_v48 = vld [vmem:[%s3847_s1 + $0x268] sm:$0xff]  ;;  %v2024_v50 = vld [vmem:[%s3847_s1 + $0x270] sm:$0xff] }
 0xd0d   :  { %2989 = vmatprep.subr.bf16.mxu0 %v2988_v56 }
 0xd0e   :  { %2991 = vmatpush3.bf16.msra.mxu0 %v2988_v56 }
 0xd0f   :  { %2993 = vmatprep.subr.bf16.mxu0 %v2992_v58 }
 0xd12   :  { %2995 = vmatpush3.bf16.msra.mxu0 %v2992_v58 }
 0xd13   :  { %2997 = vmatprep.subr.bf16.mxu0 %v2996_v61 }
 0xd16   :  { %2999 = vmatpush3.bf16.msra.mxu0 %v2996_v61 }
 0xd17   :  { %3001 = vmatprep.subr.bf16.mxu0 %v3000_v62 }
 0xd1a   :  { %3003 = vmatpush3.bf16.msra.mxu0 %v3000_v62 }
 0xd81   :  { %v1442_v31 = vpop.trf.xlu0 }
 0xd82   :  { %1462 = vrot.lane.b32.xlu1 %v1442_v31, %s3156_s18 }
 0xd85   :  { %v1443_v32 = vpop.trf.xlu0 }
 0xd86   :  { %1474 = vrot.lane.b32.xlu1 %v1442_v31, %s3157_s19 }
 0xd89   :  { %v1444_v34 = vpop.trf.xlu0 }
 0xd8a   :  { %1486 = vrot.lane.b32.xlu1 %v1442_v31, %s3158_s20 }
 0xd8d   :  { %v1445_v35 = vpop.trf.xlu0 }
 0xd8e   :  { %1464 = vrot.lane.b32.xlu1 %v1443_v32, %s3156_s18  ;;  %1480 = vrot.lane.b32.xlu0 %v1445_v35, %s3157_s19 }
 0xd92   :  { %1476 = vrot.lane.b32.xlu1 %v1443_v32, %s3157_s19 }
 0xd96   :  { %1488 = vrot.lane.b32.xlu1 %v1443_v32, %s3158_s20 }
 0xd9a   :  { %1466 = vrot.lane.b32.xlu1 %v1444_v34, %s3156_s18 }
 0xd9e   :  { %1478 = vrot.lane.b32.xlu1 %v1444_v34, %s3157_s19 }
 0xda2   :  { %1468 = vrot.lane.b32.xlu1 %v1445_v35, %s3156_s18 }
 0xda6   :  { %1490 = vrot.lane.b32.xlu1 %v1444_v34, %s3158_s20 }
 0xdaa   :  { %1492 = vrot.lane.b32.xlu1 %v1445_v35, %s3158_s20 }
 0xdf4   :  { %v1463_v38 = vpop.permute.xlu1 %1462 }
 0xdf5   :  { %v1498_v0 = vsel %vm510_vm3, %v1442_v31, %v1463_v38  ;;  %v2303_v31 = vld [vmem:[%s3847_s1 + $0x2af] ss:$0 sm:$0xff] }
 0xdf8   :  { %v1475_v41 = vpop.permute.xlu1 %1474 }
 0xdf9   :  { %v1502_v1 = vsel %vm140_vm2, %v1498_v0, %v1475_v41 }
 0xdfc   :  { %v1487_v42 = vpop.permute.xlu1 %1486 }
 0xdfd   :  { %v1506_v2 = vsel %vm519_vm4, %v1502_v1, %v1487_v42 }
 0xdfe   :  { %v1510_v9 = vmul.f32 %v1506_v2, %v3388_v5 }
 0xe00   :  { %v1465_v43 = vpop.permute.xlu1 %1464  ;;  %v1481_v23 = vpop.permute.xlu0 %1480 }
 0xe01   :  { %v1499_v3 = vsel %vm510_vm3, %v1443_v32, %v1465_v43 }
 0xe04   :  { %v1477_v63 = vpop.permute.xlu1 %1476 }
 0xe05   :  { %v1503_v4 = vsel %vm140_vm2, %v1499_v3, %v1477_v63 }
 0xe08   :  { %v1489_v6 = vpop.permute.xlu1 %1488 }
 0xe09   :  { %v1507_v8 = vsel %vm519_vm4, %v1503_v4, %v1489_v6 }
 0xe0a   :  { %v1511_v10 = vmul.f32 %v1507_v8, %v3394_v7 }
 0xe0c   :  { %v1467_v11 = vpop.permute.xlu1 %1466  ;;  %v2980_v12 = vpack.c.bf16 %v1511_v10, %v1510_v9  ;;  %v1907_v10 = vld [vmem:[%s3848_s2 + $0x28] sm:$0xff] }
 0xe0d   :  { %v1500_v20 = vsel %vm510_vm3, %v1444_v34, %v1467_v11  ;;  %v1908_v11 = vld [vmem:[%s3848_s2 + $0x30] sm:$0xff] }
 0xe0e   :  { %2981 = vmatprep.subr.bf16.mxu1 %v2980_v12 }
 0xe0f   :  { %2983 = vmatpush3.bf16.msra.mxu1 %v2980_v12  ;;  %v3028_v12 = vpack.c.bf16 %v1908_v11, %v1907_v10 }
 0xe10   :  { %v1479_v13 = vpop.permute.xlu1 %1478 }
 0xe11   :  { %v1504_v26 = vsel %vm140_vm2, %v1500_v20, %v1479_v13  ;;  %v1909_v13 = vld [vmem:[%s3848_s2 + $0x38] sm:$0xff]  ;;  %v2015_v20 = vld [vmem:[%s3847_s1 + $0x228] sm:$0xff] }
 0xe14   :  { %v1469_v14 = vpop.permute.xlu1 %1468 }
 0xe15   :  { %v1501_v24 = vsel %vm510_vm3, %v1445_v35, %v1469_v14  ;;  %v1910_v14 = vld [vmem:[%s3848_s2 + $0x40] sm:$0xff] }
 0xe16   :  { %v1505_v5 = vsel %vm140_vm2, %v1501_v24, %v1481_v23  ;;  %v2016_v23 = vld [vmem:[%s3847_s1 + $0x230] sm:$0xff] }
 0xe17   :  { %v3036_v24 = vpack.c.bf16 %v2016_v23, %v2015_v20  ;;  %v2311_v23 = vld [vmem:[%s3847_s1 + $0x2b0] ss:$0 sm:$0xff] }
 0xe18   :  { %v1491_v15 = vpop.permute.xlu1 %1490 }
 0xe19   :  { %v1508_v28 = vsel %vm519_vm4, %v1504_v26, %v1491_v15  ;;  %v3032_v15 = vpack.c.bf16 %v1910_v14, %v1909_v13 }
 0xe1a   :  { %v1512_v19 = vmul.f32 %v1508_v28, %v3405_v21 }
 0xe1c   :  { %v1493_v29 = vpop.permute.xlu1 %1492 }
 0xe1d   :  { %v1509_v7 = vsel %vm519_vm4, %v1505_v5, %v1493_v29 }
 0xe1e   :  { %v1513_v30 = vmul.f32 %v1509_v7, %v3412_v25 }
 0xe20   :  { %v2984_v36 = vpack.c.bf16 %v1513_v30, %v1512_v19 }
 0xe22   :  { %2985 = vmatprep.subr.bf16.mxu1 %v2984_v36 }
 0xe23   :  { %2987 = vmatpush3.bf16.msra.mxu1 %v2984_v36  ;;  %v2306_v36 = vld [vmem:[%s3847_s1 + $0x2aa] ss:$0 sm:$0xff] }
 0xe24   :  { %3005 = vmatprep.subr.bf16.mxu1 %v3444_v49 }
 0xe26   :  { %2704 = vmatmul.mubr.msk.f32.vlgmr.msra.gmra.mrb[20].mxu1 %vm140_vm2, %v3640_v27 }
 0xe27   :  { %3007 = vmatpush3.bf16.msra.mxu1 %v3444_v49 }
 0xe28   :  { %3009 = vmatprep.subr.bf16.mxu1 %v3449_v57 }
 0xe2b   :  { %3011 = vmatpush3.bf16.msra.mxu1 %v3449_v57 }
 0xe2c   :  { %3013 = vmatprep.subr.bf16.mxu1 %v3458_v59 }
 0xe2f   :  { %3015 = vmatpush3.bf16.msra.mxu1 %v3458_v59 }
 0xe30   :  { %3017 = vmatprep.subr.bf16.mxu1 %v3464_v60 }
 0xe33   :  { %3019 = vmatpush3.bf16.msra.mxu1 %v3464_v60 }
 0xe34   :  { %3029 = vmatprep.subr.bf16.mxu1 %v3028_v12 }
 0xef9   :  { %v2705_v21 = vpop.f32.mrb[20].mxu1 }
 0xefa   :  { %v1586_v25 = vpop.f32.mrb[21].mxu1  ;;  %v1592_v27 = vadd.f32 %v2705_v21, %v3431_v39 }
 0xefb   :  { %v1587_v18 = vadd.f32 %v1586_v25, %v3436_v22  ;;  %v1775_v22 = vld [vmem:[%s3847_s1 + $0x208] sm:$0xff] }
 0xefc   :  { %v1598_v37 = vsel %vm609_vm5, %v1592_v27, -inf  ;;  %v3020_v47 = vpack.c.bf16 %v1776_v46, %v1775_v22  ;;  %v2307_v25 = vld [vmem:[%s3847_s1 + $0x2ab] ss:$0 sm:$0xff]  ;;  %v2021_v22 = vld [vmem:[%s3847_s1 + $0x258] sm:$0xff]  ;;  %v2022_v46 = vld [vmem:[%s3847_s1 + $0x260] sm:$0xff] }
 0xefd   :  { %v1595_v49 = vsel %vm609_vm5, %v1587_v18, -inf }
 0xefe   :  { %1596 = vmax.xlane.f32.xlu1 %v1595_v49  ;;  %3021 = vmatprep.subr.bf16.mxu0 %v3020_v47 }
 0xf02   :  { %1599 = vmax.xlane.f32.xlu1 %v1598_v37 }
 0xf8b   :  { %v1597_v57 = vpop.xlane.xlu1 %1596 }
 0xf8c   :  { %v1601_v33 = vsub.f32 %v1587_v18, %v1597_v57 }
 0xf8e   :  { %v1603_v40 = vmul.f32 1.442695, %v1601_v33 }
 0xf8f   :  { %v1600_v59 = vpop.xlane.xlu1 %1599 }
 0xf90   :  { %3110 = vpow2.f32 %v1603_v40  ;;  %v1602_v44 = vsub.f32 %v1592_v27, %v1600_v59  ;;  %v2017_v40 = vld [vmem:[%s3847_s1 + $0x238] sm:$0xff]  ;;  %v2018_v59 = vld [vmem:[%s3847_s1 + $0x240] sm:$0xff] }
 0xf92   :  { %v1605_v45 = vmul.f32 1.442695, %v1602_v44  ;;  %v3040_v44 = vpack.c.bf16 %v2018_v59, %v2017_v40  ;;  %v2154_v40 = vld [vmem:[%s3848_s2 + $0x58] sm:$0xff] }
 0xf94   :  { %3112 = vpow2.f32 %v1605_v45  ;;  %v2019_v45 = vld [vmem:[%s3847_s1 + $0x248] sm:$0xff] }
 0xf9a   :  { %v3111_v60 = vpop.eup %3110 }
 0xf9b   :  { %2722 = vmatprep.mubr.msk.f32.mxu0 %vm609_vm5, %v3111_v60  ;;  %2741 = vmatprep.mubr.msk.f32.mxu1 %vm609_vm5, %v3111_v60  ;;  %v2020_v60 = vld [vmem:[%s3847_s1 + $0x250] sm:$0xff] }
 0xf9e   :  { %v3113_v39 = vpop.eup %3112 }
 0xf9f   :  { %2723 = vmatmul.mubr.msk.f32.vlgmr.msra.gmra.mrb[6].mxu0 %vm609_vm5, %v3113_v39  ;;  %2742 = vmatmul.mubr.msk.f32.vlgmr.msra.gmra.mrb[22].mxu1 %vm609_vm5, %v3113_v39  ;;  %v3044_v39 = vpack.c.bf16 %v2020_v60, %v2019_v45  ;;  %v2156_v45 = vld [vmem:[%s3848_s2 + $0x68] sm:$0xff] }
 0xfa0   :  { %3023 = vmatpush3.bf16.msra.mxu0 %v3020_v47  ;;  %3031 = vmatpush3.bf16.msra.mxu1 %v3028_v12  ;;  %v3048_v47 = vpack.c.bf16 %v2022_v46, %v2021_v22 }
 0xfa1   :  { %3025 = vmatprep.subr.bf16.mxu0 %v3024_v51  ;;  %3033 = vmatprep.subr.bf16.mxu1 %v3032_v15 }
 0xfa4   :  { %3027 = vmatpush3.bf16.msra.mxu0 %v3024_v51  ;;  %3035 = vmatpush3.bf16.msra.mxu1 %v3032_v15  ;;  %v2025_v51 = vld [vmem:[%s3847_s1 + $0x278] sm:$0xff] }
 0xfa5   :  { %3037 = vmatprep.subr.bf16.mxu0 %v3036_v24 }
0x1072   :  { %v2724_v52 = vpop.f32.mrb[6].mxu0  ;;  %v2743_v53 = vpop.f32.mrb[22].mxu1 }
0x1073   :  { %3114 = vrcp.f32 %v2743_v53  ;;  %v1687_v54 = vpop.f32.mrb[7].mxu0  ;;  %v1762_v55 = vpop.f32.mrb[23].mxu1  ;;  %v2026_v53 = vld [vmem:[%s3847_s1 + $0x280] sm:$0xff] }
0x1074   :  { %3116 = vrcp.f32 %v1762_v55  ;;  %v2027_v55 = vld [vmem:[%s3847_s1 + $0x288] sm:$0xff] }
0x107d   :  { %v3115_v56 = vpop.eup %3114 }
0x107e   :  { %v3117_v58 = vpop.eup %3116  ;;  %v1774_v61 = vmul.f32 %v3115_v56, %v2724_v52  ;;  %v3052_v52 = vpack.c.bf16 %v2024_v50, %v2023_v48  ;;  %v2028_v56 = vld [vmem:[%s3847_s1 + $0x290] sm:$0xff] }
0x107f   :  { %v1773_v62 = vmul.f32 %v3117_v58, %v1687_v54  ;;  %v3056_v54 = vpack.c.bf16 %v2026_v53, %v2025_v51  ;;  %v3060_v58 = vpack.c.bf16 %v2028_v56, %v2027_v55 }
0x1081   :  { %2752 = vmatprep.mubr.msk.f32.mxu0 %vm140_vm2, %v1773_v62  ;;  %v2030_v62 = vld [vmem:[%s3847_s1 + $0x2a0] sm:$0xff] }
0x1082   :  { %2753 = vmatmul.mubr.msk.f32.vlgmr.msra.gmra.mrb[8].mxu0 %vm140_vm2, %v1774_v61  ;;  %v2029_v61 = vld [vmem:[%s3847_s1 + $0x298] sm:$0xff] }
0x1083   :  { %3039 = vmatpush3.bf16.msra.mxu0 %v3036_v24 }
0x1084   :  { %3041 = vmatprep.subr.bf16.mxu0 %v3040_v44 }
0x1087   :  { %3043 = vmatpush3.bf16.msra.mxu0 %v3040_v44  ;;  %v2155_v44 = vld [vmem:[%s3848_s2 + $0x60] sm:$0xff] }
0x1088   :  { %3045 = vmatprep.subr.bf16.mxu0 %v3044_v39  ;;  %v3072_v60 = vpack.c.bf16 %v2156_v45, %v2155_v44 }
0x108b   :  { %3047 = vmatpush3.bf16.msra.mxu0 %v3044_v39 }
0x108c   :  { %3049 = vmatprep.subr.bf16.mxu0 %v3048_v47 }
0x108f   :  { %3051 = vmatpush3.bf16.msra.mxu0 %v3048_v47 }
0x1090   :  { %3053 = vmatprep.subr.bf16.mxu0 %v3052_v52 }
0x1093   :  { %3055 = vmatpush3.bf16.msra.mxu0 %v3052_v52  ;;  %v2312_v52 = vld [vmem:[%s3847_s1 + $0x90] ss:$0 sm:$0xff] }
0x1094   :  { %3057 = vmatprep.subr.bf16.mxu0 %v3056_v54 }
0x1097   :  { %3059 = vmatpush3.bf16.msra.mxu0 %v3056_v54  ;;  %v2313_v54 = vld [vmem:[%s3847_s1 + $0x91] ss:$0 sm:$0xff] }
0x1098   :  { %3061 = vmatprep.subr.bf16.mxu0 %v3060_v58 }
0x109b   :  { %3063 = vmatpush3.bf16.msra.mxu0 %v3060_v58 }
0x1155   :  { %v2754_v32 = vpop.f32.mrb[8].mxu0 }
0x1156   :  { %v1862_v34 = vadd.f32 %v2754_v32, %v2303_v31  ;;  %v1856_v35 = vpop.f32.mrb[9].mxu0  ;;  %v2308_v32 = vld [vmem:[%s3848_s2 + $0x48] ss:$0 sm:$0xff] }
0x1157   :  { %v1857_v38 = vadd.f32 %v2303_v31, %v1856_v35  ;;  %v3064_v31 = vpack.c.bf16 %v2030_v62, %v2029_v61 }
0x1158   :  { %v3721_v41 = vadd.f32 %v1862_v34, %v3576_v16 }
0x1159   :  { %v3724_v42 = vadd.f32 %v1857_v38, %v3579_v17  ;;  %3065 = vmatprep.subr.bf16.mxu0 %v3064_v31 }
0x115a   :  { %v1872_v43 = vsel %vm140_vm2, %v3721_v41, 0.0  ;;  %3067 = vmatpush3.bf16.msra.mxu0 %v3064_v31 }
0x115b   :  { %1873 = vadd.xlane.f32.xlu1 %v1872_v43  ;;  %v1869_v63 = vsel %vm140_vm2, %v3724_v42, 0.0 }
0x115c   :  { %1870 = vadd.xlane.f32.xlu0 %v1869_v63 }
0x11e8   :  { %v1874_v0 = vpop.xlane.xlu1 %1873 }
0x11e9   :  { %v1876_v1 = vmul.f32 0.03125, %v1874_v0  ;;  %v1871_v2 = vpop.xlane.xlu0 %1870 }
0x11ea   :  { %v1875_v3 = vmul.f32 0.03125, %v1871_v2 }
0x11eb   :  { %v1878_v4 = vsub.f32 %v3721_v41, %v1876_v1 }
0x11ec   :  { %v1877_v16 = vsub.f32 %v3724_v42, %v1875_v3 }
0x11ed   :  { %v1880_v8 = vmul.f32 %v1878_v4, %v1878_v4 }
0x11ee   :  { %v1879_v6 = vmul.f32 %v1877_v16, %v1877_v16 }
0x11ef   :  { %v1884_v9 = vsel %vm140_vm2, %v1880_v8, 0.0 }
0x11f0   :  { %v1881_v17 = vsel %vm140_vm2, %v1879_v6, 0.0 }
0x11f1   :  { %1882 = vadd.xlane.f32.xlu1 %v1881_v17 }
0x11f5   :  { %1885 = vadd.xlane.f32.xlu1 %v1884_v9 }
0x127e   :  { %v1883_v26 = vpop.xlane.xlu1 %1882 }
0x127f   :  { %v1887_v28 = vmul.f32 0.03125, %v1883_v26 }
0x1281   :  { %v1889_v5 = vadd.f32 1e-05, %v1887_v28 }
0x1282   :  { %v1886_v29 = vpop.xlane.xlu1 %1885 }
0x1283   :  { %3118 = vrsqrt.f32 %v1889_v5  ;;  %v1888_v7 = vmul.f32 0.03125, %v1886_v29 }
0x1285   :  { %v1890_v19 = vadd.f32 1e-05, %v1888_v7 }
0x1287   :  { %3120 = vrsqrt.f32 %v1890_v19 }
0x128d   :  { %v3119_v30 = vpop.eup %3118 }
0x128e   :  { %v1893_v21 = vmul.f32 %v3119_v30, %v1877_v16 }
0x1290   :  { %v1899_v18 = vmul.f32 %v2306_v36, %v1893_v21 }
0x1291   :  { %v3121_v27 = vpop.eup %3120 }
0x1292   :  { %v1894_v49 = vmul.f32 %v3121_v27, %v1878_v4  ;;  %v1905_v37 = vadd.f32 %v2307_v25, %v1899_v18 }
0x1294   :  { %v1900_v57 = vmul.f32 %v2306_v36, %v1894_v49  ;;  %2763 = vmatprep.mubr.msk.f32.mxu1 %vm140_vm2, %v1905_v37 }
0x1296   :  { %v1906_v33 = vadd.f32 %v2307_v25, %v1900_v57 }
0x1298   :  { %2764 = vmatmul.mubr.msk.f32.vlgmr.msra.gmra.mrb[24].mxu1 %vm140_vm2, %v1906_v33 }
0x136b   :  { %v2765_v34 = vpop.f32.mrb[24].mxu1 }
0x136c   :  { %v1994_v35 = vadd.f32 %v2765_v34, %v2308_v32  ;;  %v1988_v38 = vpop.f32.mrb[25].mxu1 }
0x136d   :  { %v1989_v43 = vadd.f32 %v2308_v32, %v1988_v38 }
0x136e   :  { %v2000_v63 = vmul.f32 0.044715, %v1994_v35  ;;  %v1998_v14 = vmul.f32 0.5, %v1994_v35 }
0x136f   :  { %v1999_v0 = vmul.f32 0.044715, %v1989_v43  ;;  %v1997_v12 = vmul.f32 0.5, %v1989_v43 }
0x1370   :  { %v2002_v1 = vmul.f32 %v2000_v63, %v1994_v35 }
0x1371   :  { %v2001_v2 = vmul.f32 %v1999_v0, %v1989_v43 }
0x1372   :  { %v2004_v3 = vmul.f32 %v2002_v1, %v1994_v35 }
0x1373   :  { %v2003_v4 = vmul.f32 %v2001_v2, %v1989_v43 }
0x1374   :  { %v2006_v16 = vadd.f32 %v2004_v3, %v1994_v35 }
0x1375   :  { %v2005_v6 = vadd.f32 %v2003_v4, %v1989_v43 }
0x1376   :  { %v2008_v17 = vmul.f32 0.7978846, %v2006_v16 }
0x1377   :  { %v2007_v8 = vmul.f32 0.7978846, %v2005_v6 }
0x1378   :  { %3122 = vtanh.f32 %v2008_v17 }
0x1379   :  { %3124 = vtanh.f32 %v2007_v8 }
0x1382   :  { %v3123_v9 = vpop.eup %3122 }
0x1383   :  { %v3125_v10 = vpop.eup %3124  ;;  %v2012_v11 = vadd.f32 1.0, %v3123_v9 }
0x1384   :  { %v2011_v13 = vadd.f32 1.0, %v3125_v10 }
0x1385   :  { %v2014_v20 = vmul.f32 %v2012_v11, %v1998_v14 }
0x1386   :  { %v2013_v15 = vmul.f32 %v2011_v13, %v1997_v12 }
0x1388   :  { %2798 = vmatprep.mubr.f32.mxu0 %v2013_v15 }
0x1389   :  { %2799 = vmatmul.mubr.f32.vlgmr.msra.gmra.mrb[10].mxu0 %v2014_v20 }
0x145c   :  { %v2800_v24 = vpop.f32.mrb[10].mxu0 }
0x145d   :  { %v2102_v26 = vpop.f32.mrb[11].mxu0  ;;  %v2108_v28 = vadd.f32 %v2800_v24, %v2311_v23 }
0x145e   :  { %v2103_v5 = vadd.f32 %v2311_v23, %v2102_v26 }
0x145f   :  { %v2112_v19 = vadd.f32 %v2108_v28, %v3721_v41  ;;  %v2153_v41 = vld [vmem:[%s3848_s2 + $0x50] sm:$0xff]  ;;  %s3159_s2 = smov [#allocation2]  }
0x1460   :  { %v2111_v29 = vadd.f32 %v2103_v5, %v3724_v42  ;;  %v3068_v59 = vpack.c.bf16 %v2154_v40, %v2153_v41  ;;  %s2245_s8 = sshll.u32 %s3159_s2, 4  ;;  %s2246_s8 = int_to_ptr.vmem [resolvable:$true] %s2245_s8 }
0x1461   :  { %v2118_v30 = vsel %vm140_vm2, %v2112_v19, 0.0  ;;  %s3130_s9 = scalar_lea.vmem %s2246_s8, 256  ;;  %p3135_p1 = scmp.lt.s32.totalorder %s2246_s8, %s2246_s8 }
0x1462   :  { %v2115_v7 = vsel %vm140_vm2, %v2111_v29, 0.0  ;;  %3069 = vmatprep.subr.bf16.mxu1 %v3068_v59  ;;  %p3131_p0 = scmp.ne.s32.totalorder %s2246_s8, %s3130_s9  ;;  %p3136_p2 = scmp.lt.s32.totalorder %s3130_s9, %s3130_s9 }
0x1463   :  { %2116 = vadd.xlane.f32.xlu1 %v2115_v7  ;;  %3071 = vmatpush3.bf16.msra.mxu1 %v3068_v59 }
0x1464   :  { %3073 = vmatprep.subr.bf16.mxu1 %v3072_v60  ;;  %p3137_p3 = por %p3136_p2, %p3135_p1 }
0x1466   :  { %p3138_p4 = pnand %p3137_p3, %p3131_p0 }
0x1467   :  { %2119 = vadd.xlane.f32.xlu1 %v2118_v30  ;;  %3075 = vmatpush3.bf16.msra.mxu1 %v3072_v60 }
0x14f0   :  { %v2117_v36 = vpop.xlane.xlu1 %2116 }
0x14f1   :  { %v2121_v21 = vmul.f32 0.03125, %v2117_v36 }
0x14f3   :  { %v2123_v25 = vsub.f32 %v2111_v29, %v2121_v21 }
0x14f4   :  { %v2120_v18 = vpop.xlane.xlu1 %2119 }
0x14f5   :  { %v2122_v27 = vmul.f32 0.03125, %v2120_v18  ;;  %v2125_v49 = vmul.f32 %v2123_v25, %v2123_v25 }
0x14f7   :  { %v2124_v37 = vsub.f32 %v2112_v19, %v2122_v27  ;;  %v2127_v57 = vsel %vm140_vm2, %v2125_v49, 0.0 }
0x14f8   :  { %2128 = vadd.xlane.f32.xlu1 %v2127_v57 }
0x14f9   :  { %v2126_v33 = vmul.f32 %v2124_v37, %v2124_v37 }
0x14fb   :  { %v2130_v42 = vsel %vm140_vm2, %v2126_v33, 0.0 }
0x14fc   :  { %2131 = vadd.xlane.f32.xlu1 %v2130_v42 }
0x1585   :  { %v2129_v39 = vpop.xlane.xlu1 %2128 }
0x1586   :  { %v2133_v22 = vmul.f32 0.03125, %v2129_v39 }
0x1588   :  { %v2135_v46 = vadd.f32 1e-05, %v2133_v22 }
0x1589   :  { %v2132_v47 = vpop.xlane.xlu1 %2131 }
0x158a   :  { %3126 = vrsqrt.f32 %v2135_v46  ;;  %v2134_v48 = vmul.f32 0.03125, %v2132_v47 }
0x158c   :  { %v2136_v50 = vadd.f32 1e-05, %v2134_v48 }
0x158e   :  { %3128 = vrsqrt.f32 %v2136_v50 }
0x1594   :  { %v3127_v51 = vpop.eup %3126 }
0x1595   :  { %v2139_v53 = vmul.f32 %v3127_v51, %v2123_v25 }
0x1597   :  { %v2145_v55 = vmul.f32 %v2312_v52, %v2139_v53 }
0x1598   :  { %v3129_v56 = vpop.eup %3128 }
0x1599   :  { %v2140_v58 = vmul.f32 %v3129_v56, %v2124_v37  ;;  %v2151_v61 = vadd.f32 %v2313_v54, %v2145_v55 }
0x159b   :  { %v2146_v62 = vmul.f32 %v2312_v52, %v2140_v58  ;;  %2809 = vmatprep.mubr.msk.f32.mxu1 %vm140_vm2, %v2151_v61 }
0x159d   :  { %v2152_v31 = vadd.f32 %v2313_v54, %v2146_v62 }
0x159f   :  { %2810 = vmatmul.mubr.msk.f32.vlgmr.msra.gmra.mrb[26].mxu1 %vm140_vm2, %v2152_v31 }
0x1672   :  { %v2811_v32 = vpop.f32.mrb[26].mxu1 }
0x1673   :  { %2239 = vst [vmem:[#allocation2 + $0x8] sm:$0xff] %v2811_v32  ;;  %v2229_v34 = vpop.f32.mrb[27].mxu1 }
0x1674   :  { %2238 = vst [vmem:[#allocation2] sm:$0xff] %v2229_v34 }
0x1675   :  { %3141 = shalt.err (!%p3138_p4)
}
0x1676   :  { %s3142_s11 = scalar_lea.hbm %s3849_s3, 256 }
0x1677   :  { %p3143_p5 = scmp.ne.s32.totalorder %s3849_s3, %s3142_s11  ;;  %p3146_p6 = scmp.lt.u32.totalorder %s3142_s11, %s3849_s3 }
0x1679   :  { %p3148_p7 = pnand %p3146_p6, %p3143_p5 }
0x167b   :  { %3151 = shalt.err (!%p3148_p7)
}
0x167c   :  { %s3160_s16 = smov 128   ;;  %s3161_s17 = smov 8  }
0x167d   :  { %2251 = dma.vmem_to_hbm [thread:$0]  %s2246_s8, 256, %s3849_s3, [#allocation3], %s3160_s16, %s3160_s16, %s3161_s17  }
0x167e   :  { %3152 = dma.done.wait [#allocation3], 256  }
0x167f   :  { %3153 = vsyncadd [#allocation3], 4294967040 }
0x1680   :  { %2255 = vsyncpa [#allocation3], 1 }

</bundles_post_ra>
